<compile_context>
chip_gen: v7x
topology: tpu7x:2x2x1
jax: 0.10.0
libtpu: 0.0.40
codegen_flags: <defaults>
</compile_context>

<pallas_src>
import math

import jax
import jax.numpy as jnp
from jax.experimental import pallas as pl
from jax.experimental.pallas import tpu as pltpu

HIDDEN = 400
HIDDEN_PAD = 512   # 400 rounded up to a multiple of 128 lanes
OUT_PAD = 128      # lane-dense output slab; real output lives in column 0


def _round_up(n, m):
    return ((n + m - 1) // m) * m


def confidnet_kernel(x_ref,
                     w1_ref, b1_ref,
                     w2_ref, b2_ref,
                     w3_ref, b3_ref,
                     w4_ref, b4_ref,
                     w5_ref, b5_ref,
                     o_ref):
    # Layers 1..4: bf16 matmul on the MXU with f32 accumulation; bias+ReLU in f32,
    # cast back to bf16 before the next dot.
    h = jnp.dot(x_ref[...], w1_ref[...], preferred_element_type=jnp.float32)
    h = jnp.maximum(h + b1_ref[...], 0.0).astype(jnp.bfloat16)

    h = jnp.dot(h, w2_ref[...], preferred_element_type=jnp.float32)
    h = jnp.maximum(h + b2_ref[...], 0.0).astype(jnp.bfloat16)

    h = jnp.dot(h, w3_ref[...], preferred_element_type=jnp.float32)
    h = jnp.maximum(h + b3_ref[...], 0.0).astype(jnp.bfloat16)

    h = jnp.dot(h, w4_ref[...], preferred_element_type=jnp.float32)
    h = jnp.maximum(h + b4_ref[...], 0.0).astype(jnp.bfloat16)

    # Final layer padded to 128 output lanes (only lane 0 is real) -> unmasked stores.
    logits = jnp.dot(h, w5_ref[...], preferred_element_type=jnp.float32) + b5_ref[...]
    o_ref[...] = jax.nn.sigmoid(logits).astype(o_ref.dtype)


def init_confidnet_params(key, input_size=128, hidden=HIDDEN):
    """PyTorch nn.Linear-style init (uniform +/- 1/sqrt(fan_in)) at logical sizes.
    Weights stored as [in, out] (transposed vs. PyTorch's [out, in])."""
    dims = [(input_size, hidden), (hidden, hidden), (hidden, hidden),
            (hidden, hidden), (hidden, 1)]
    params = []
    for (fan_in, fan_out) in dims:
        key, kw, kb = jax.random.split(key, 3)
        bound = 1.0 / math.sqrt(fan_in)
        w = jax.random.uniform(kw, (fan_in, fan_out), jnp.float32, -bound, bound)
        b = jax.random.uniform(kb, (1, fan_out), jnp.float32, -bound, bound)
        params.append((w, b))
    return params


def _pad2(a, rows, cols):
    return jnp.pad(a, ((0, rows - a.shape[0]), (0, cols - a.shape[1])))


def prepare_padded_params(params, input_pad):
    """Zero-pad to lane-aligned shapes; weights -> bf16, biases stay f32."""
    (w1, b1), (w2, b2), (w3, b3), (w4, b4), (w5, b5) = params
    flat = [
        _pad2(w1, input_pad, HIDDEN_PAD).astype(jnp.bfloat16),
        _pad2(b1, 1, HIDDEN_PAD),
        _pad2(w2, HIDDEN_PAD, HIDDEN_PAD).astype(jnp.bfloat16),
        _pad2(b2, 1, HIDDEN_PAD),
        _pad2(w3, HIDDEN_PAD, HIDDEN_PAD).astype(jnp.bfloat16),
        _pad2(b3, 1, HIDDEN_PAD),
        _pad2(w4, HIDDEN_PAD, HIDDEN_PAD).astype(jnp.bfloat16),
        _pad2(b4, 1, HIDDEN_PAD),
        _pad2(w5, HIDDEN_PAD, OUT_PAD).astype(jnp.bfloat16),
        _pad2(b5, 1, OUT_PAD),
    ]
    return flat


def confidnet_forward(x, params, tb=None):
    """x: [B, input_size] float32 -> [B, 1] float32 (sigmoid confidence)."""
    B, in_size = x.shape
    in_pad = _round_up(in_size, 128)
    flat = prepare_padded_params(params, in_pad)

    # Batch tile: fill the 256-wide MXU M-dim when B is large; otherwise one tile.
    if tb is None:
        tb = 256 if B >= 256 else _round_up(max(B, 8), 8)
    B_pad = _round_up(B, tb)
    grid = (B_pad // tb,)

    x_p = _pad2(x, B_pad, in_pad).astype(jnp.bfloat16)

    x_spec = pl.BlockSpec((tb, in_pad), lambda i: (i, 0))
    out_spec = pl.BlockSpec((tb, OUT_PAD), lambda i: (i, 0))
    # Weights/biases: full-array blocks with a constant index_map -> stay resident
    # in VMEM across all grid steps (no re-DMA per tile).
    param_specs = [pl.BlockSpec(p.shape, lambda i: (0, 0)) for p in flat]

    weight_bytes = sum(int(p.size) * p.dtype.itemsize for p in flat)
    flops = 2 * B_pad * (in_pad * HIDDEN_PAD
                         + 3 * HIDDEN_PAD * HIDDEN_PAD
                         + HIDDEN_PAD * OUT_PAD)
    cost = pl.CostEstimate(
        flops=flops,
        transcendentals=B_pad * OUT_PAD,
        bytes_accessed=weight_bytes + int(x_p.size) * 2 + B_pad * OUT_PAD * 4,
    )

    out = pl.pallas_call(
        confidnet_kernel,
        out_shape=jax.ShapeDtypeStruct((B_pad, OUT_PAD), jnp.float32),
        grid=grid,
        in_specs=[x_spec] + param_specs,
        out_specs=out_spec,
        compiler_params=pltpu.CompilerParams(dimension_semantics=("parallel",)),
        cost_estimate=cost,
    )(x_p, *flat)

    return out[:B, 0:1]


def confidnet_ref_f32(x, params):
    h = x
    for (w, b) in params[:-1]:
        h = jnp.maximum(h @ w + b, 0.0)
    w, b = params[-1]
    return jax.nn.sigmoid(h @ w + b)


def confidnet_ref_bf16(x, params):
    """Plain-JAX reference with the same precision recipe as the kernel."""
    h = x.astype(jnp.bfloat16)
    for (w, b) in params[:-1]:
        h = jnp.dot(h, w.astype(jnp.bfloat16), preferred_element_type=jnp.float32)
        h = jnp.maximum(h + b, 0.0).astype(jnp.bfloat16)
    w, b = params[-1]
    logits = jnp.dot(h, w.astype(jnp.bfloat16),
                     preferred_element_type=jnp.float32) + b
    return jax.nn.sigmoid(logits)


if __name__ == "__main__":
    key = jax.random.PRNGKey(0)
    k_x, k_x2, k_p = jax.random.split(key, 3)

    INPUT_SIZE = 128
    params = init_confidnet_params(k_p, input_size=INPUT_SIZE, hidden=HIDDEN)

    # Small batch (single grid step).
    B1 = 8
    x1 = jax.random.normal(k_x, (B1, INPUT_SIZE), dtype=jnp.float32)
    out1 = jax.block_until_ready(confidnet_forward(x1, params))
    assert out1.shape == (B1, 1), out1.shape
    assert jnp.allclose(out1, confidnet_ref_bf16(x1, params), atol=1e-3), \
        "mismatch vs bf16-precision reference (B=8)"
    assert jnp.allclose(out1, confidnet_ref_f32(x1, params), atol=2e-2), \
        "mismatch vs f32 reference (B=8)"

    # Unaligned batch (multi-step grid, batch padding exercised).
    B2 = 300
    x2 = jax.random.normal(k_x2, (B2, INPUT_SIZE), dtype=jnp.float32)
    out2 = jax.block_until_ready(confidnet_forward(x2, params))
    assert out2.shape == (B2, 1), out2.shape
    assert jnp.allclose(out2, confidnet_ref_bf16(x2, params), atol=1e-3), \
        "mismatch vs bf16-precision reference (B=300)"
    assert jnp.allclose(out2, confidnet_ref_f32(x2, params), atol=2e-2), \
        "mismatch vs f32 reference (B=300)"

    print("KERNEL_OK")
</pallas_src>

<mosaic_0001>
module attributes {stable_mosaic.version = 11 : i64} {
  func.func @confidnet_kernel(%arg0: i32, %arg1: memref<8x128xbf16, #tpu.memory_space<vmem>>, %arg2: memref<128x512xbf16, #tpu.memory_space<vmem>>, %arg3: memref<1x512xf32, #tpu.memory_space<vmem>>, %arg4: memref<512x512xbf16, #tpu.memory_space<vmem>>, %arg5: memref<1x512xf32, #tpu.memory_space<vmem>>, %arg6: memref<512x512xbf16, #tpu.memory_space<vmem>>, %arg7: memref<1x512xf32, #tpu.memory_space<vmem>>, %arg8: memref<512x512xbf16, #tpu.memory_space<vmem>>, %arg9: memref<1x512xf32, #tpu.memory_space<vmem>>, %arg10: memref<512x128xbf16, #tpu.memory_space<vmem>>, %arg11: memref<1x128xf32, #tpu.memory_space<vmem>>, %arg12: memref<8x128xf32, #tpu.memory_space<vmem>>) attributes {dimension_semantics = [#tpu.dimension_semantics<parallel>], iteration_bounds = array<i64: 1>, scalar_prefetch = 0 : i64, scratch_operands = 0 : i64, tpu.core_type = #tpu.core_type<tc>, window_params = [{transform_indices = @transform_0, window_bounds = array<i64: 8, 128>}, {pipeline_mode = #tpu.pipeline_mode<synchronous>, transform_indices = @transform_1, window_bounds = array<i64: 128, 512>}, {pipeline_mode = #tpu.pipeline_mode<synchronous>, transform_indices = @transform_2, window_bounds = array<i64: 1, 512>}, {pipeline_mode = #tpu.pipeline_mode<synchronous>, transform_indices = @transform_3, window_bounds = array<i64: 512, 512>}, {pipeline_mode = #tpu.pipeline_mode<synchronous>, transform_indices = @transform_4, window_bounds = array<i64: 1, 512>}, {pipeline_mode = #tpu.pipeline_mode<synchronous>, transform_indices = @transform_5, window_bounds = array<i64: 512, 512>}, {pipeline_mode = #tpu.pipeline_mode<synchronous>, transform_indices = @transform_6, window_bounds = array<i64: 1, 512>}, {pipeline_mode = #tpu.pipeline_mode<synchronous>, transform_indices = @transform_7, window_bounds = array<i64: 512, 512>}, {pipeline_mode = #tpu.pipeline_mode<synchronous>, transform_indices = @transform_8, window_bounds = array<i64: 1, 512>}, {pipeline_mode = #tpu.pipeline_mode<synchronous>, transform_indices = @transform_9, window_bounds = array<i64: 512, 128>}, {pipeline_mode = #tpu.pipeline_mode<synchronous>, transform_indices = @transform_10, window_bounds = array<i64: 1, 128>}, {transform_indices = @transform_11, window_bounds = array<i64: 8, 128>}]} {
    %c0 = arith.constant 0 : index
    %c0_0 = arith.constant 0 : index
    %0 = vector.load %arg1[%c0, %c0_0] : memref<8x128xbf16, #tpu.memory_space<vmem>>, vector<8x128xbf16>
    %c0_1 = arith.constant 0 : index
    %c0_2 = arith.constant 0 : index
    %1 = vector.load %arg2[%c0_1, %c0_2] : memref<128x512xbf16, #tpu.memory_space<vmem>>, vector<128x512xbf16>
    %cst = arith.constant dense<0.000000e+00> : vector<8x512xf32>
    %2 = tpu.matmul %0, %1, %cst {dimension_numbers = #tpu.dot_dimension_numbers<[1], [0], [0], [1], [0, 0, 1, 1], [], []>} : vector<8x128xbf16>, vector<128x512xbf16>, vector<8x512xf32> -> vector<8x512xf32>
    %c0_3 = arith.constant 0 : index
    %c0_4 = arith.constant 0 : index
    %3 = vector.load %arg3[%c0_3, %c0_4] : memref<1x512xf32, #tpu.memory_space<vmem>>, vector<1x512xf32>
    %4 = vector.broadcast %3 : vector<1x512xf32> to vector<8x512xf32>
    %5 = arith.addf %2, %4 : vector<8x512xf32>
    %cst_5 = arith.constant 0.000000e+00 : f32
    %6 = vector.broadcast %cst_5 : f32 to vector<8x512xf32>
    %7 = arith.maximumf %5, %6 : vector<8x512xf32>
    %8 = arith.truncf %7 : vector<8x512xf32> to vector<8x512xbf16>
    %c0_6 = arith.constant 0 : index
    %c0_7 = arith.constant 0 : index
    %9 = vector.load %arg4[%c0_6, %c0_7] : memref<512x512xbf16, #tpu.memory_space<vmem>>, vector<512x512xbf16>
    %cst_8 = arith.constant dense<0.000000e+00> : vector<8x512xf32>
    %10 = tpu.matmul %8, %9, %cst_8 {dimension_numbers = #tpu.dot_dimension_numbers<[1], [0], [0], [1], [0, 0, 1, 1], [], []>} : vector<8x512xbf16>, vector<512x512xbf16>, vector<8x512xf32> -> vector<8x512xf32>
    %c0_9 = arith.constant 0 : index
    %c0_10 = arith.constant 0 : index
    %11 = vector.load %arg5[%c0_9, %c0_10] : memref<1x512xf32, #tpu.memory_space<vmem>>, vector<1x512xf32>
    %12 = vector.broadcast %11 : vector<1x512xf32> to vector<8x512xf32>
    %13 = arith.addf %10, %12 : vector<8x512xf32>
    %cst_11 = arith.constant 0.000000e+00 : f32
    %14 = vector.broadcast %cst_11 : f32 to vector<8x512xf32>
    %15 = arith.maximumf %13, %14 : vector<8x512xf32>
    %16 = arith.truncf %15 : vector<8x512xf32> to vector<8x512xbf16>
    %c0_12 = arith.constant 0 : index
    %c0_13 = arith.constant 0 : index
    %17 = vector.load %arg6[%c0_12, %c0_13] : memref<512x512xbf16, #tpu.memory_space<vmem>>, vector<512x512xbf16>
    %cst_14 = arith.constant dense<0.000000e+00> : vector<8x512xf32>
    %18 = tpu.matmul %16, %17, %cst_14 {dimension_numbers = #tpu.dot_dimension_numbers<[1], [0], [0], [1], [0, 0, 1, 1], [], []>} : vector<8x512xbf16>, vector<512x512xbf16>, vector<8x512xf32> -> vector<8x512xf32>
    %c0_15 = arith.constant 0 : index
    %c0_16 = arith.constant 0 : index
    %19 = vector.load %arg7[%c0_15, %c0_16] : memref<1x512xf32, #tpu.memory_space<vmem>>, vector<1x512xf32>
    %20 = vector.broadcast %19 : vector<1x512xf32> to vector<8x512xf32>
    %21 = arith.addf %18, %20 : vector<8x512xf32>
    %cst_17 = arith.constant 0.000000e+00 : f32
    %22 = vector.broadcast %cst_17 : f32 to vector<8x512xf32>
    %23 = arith.maximumf %21, %22 : vector<8x512xf32>
    %24 = arith.truncf %23 : vector<8x512xf32> to vector<8x512xbf16>
    %c0_18 = arith.constant 0 : index
    %c0_19 = arith.constant 0 : index
    %25 = vector.load %arg8[%c0_18, %c0_19] : memref<512x512xbf16, #tpu.memory_space<vmem>>, vector<512x512xbf16>
    %cst_20 = arith.constant dense<0.000000e+00> : vector<8x512xf32>
    %26 = tpu.matmul %24, %25, %cst_20 {dimension_numbers = #tpu.dot_dimension_numbers<[1], [0], [0], [1], [0, 0, 1, 1], [], []>} : vector<8x512xbf16>, vector<512x512xbf16>, vector<8x512xf32> -> vector<8x512xf32>
    %c0_21 = arith.constant 0 : index
    %c0_22 = arith.constant 0 : index
    %27 = vector.load %arg9[%c0_21, %c0_22] : memref<1x512xf32, #tpu.memory_space<vmem>>, vector<1x512xf32>
    %28 = vector.broadcast %27 : vector<1x512xf32> to vector<8x512xf32>
    %29 = arith.addf %26, %28 : vector<8x512xf32>
    %cst_23 = arith.constant 0.000000e+00 : f32
    %30 = vector.broadcast %cst_23 : f32 to vector<8x512xf32>
    %31 = arith.maximumf %29, %30 : vector<8x512xf32>
    %32 = arith.truncf %31 : vector<8x512xf32> to vector<8x512xbf16>
    %c0_24 = arith.constant 0 : index
    %c0_25 = arith.constant 0 : index
    %33 = vector.load %arg10[%c0_24, %c0_25] : memref<512x128xbf16, #tpu.memory_space<vmem>>, vector<512x128xbf16>
    %cst_26 = arith.constant dense<0.000000e+00> : vector<8x128xf32>
    %34 = tpu.matmul %32, %33, %cst_26 {dimension_numbers = #tpu.dot_dimension_numbers<[1], [0], [0], [1], [0, 0, 1, 1], [], []>} : vector<8x512xbf16>, vector<512x128xbf16>, vector<8x128xf32> -> vector<8x128xf32>
    %c0_27 = arith.constant 0 : index
    %c0_28 = arith.constant 0 : index
    %35 = vector.load %arg11[%c0_27, %c0_28] : memref<1x128xf32, #tpu.memory_space<vmem>>, vector<1x128xf32>
    %36 = vector.broadcast %35 : vector<1x128xf32> to vector<8x128xf32>
    %37 = arith.addf %34, %36 : vector<8x128xf32>
    %38 = arith.negf %37 : vector<8x128xf32>
    %39 = math.exp %38 : vector<8x128xf32>
    %cst_29 = arith.constant 1.000000e+00 : f32
    %40 = vector.broadcast %cst_29 : f32 to vector<8x128xf32>
    %41 = arith.addf %40, %39 : vector<8x128xf32>
    %42 = arith.divf %40, %41 : vector<8x128xf32>
    %c0_30 = arith.constant 0 : index
    %c0_31 = arith.constant 0 : index
    %43 = vector.load %arg12[%c0_30, %c0_31] : memref<8x128xf32, #tpu.memory_space<vmem>>, vector<8x128xf32>
    tpu.vector_store %arg12[%c0_30, %c0_31], %42 {strides = array<i32>} : memref<8x128xf32, #tpu.memory_space<vmem>>, vector<8x128xf32>,
    return
  }
  func.func @transform_0(%arg0: i32) -> (i32, i32) {
    %c0_i32 = arith.constant 0 : i32
    %c0_i32_0 = arith.constant 0 : i32
    return %arg0, %c0_i32 : i32, i32
  }
  func.func @transform_1(%arg0: i32) -> (i32, i32) {
    %c0_i32 = arith.constant 0 : i32
    %c0_i32_0 = arith.constant 0 : i32
    %c0_i32_1 = arith.constant 0 : i32
    return %c0_i32, %c0_i32_0 : i32, i32
  }
  func.func @transform_2(%arg0: i32) -> (i32, i32) {
    %c0_i32 = arith.constant 0 : i32
    %c0_i32_0 = arith.constant 0 : i32
    %c0_i32_1 = arith.constant 0 : i32
    return %c0_i32, %c0_i32_0 : i32, i32
  }
  func.func @transform_3(%arg0: i32) -> (i32, i32) {
    %c0_i32 = arith.constant 0 : i32
    %c0_i32_0 = arith.constant 0 : i32
    %c0_i32_1 = arith.constant 0 : i32
    return %c0_i32, %c0_i32_0 : i32, i32
  }
  func.func @transform_4(%arg0: i32) -> (i32, i32) {
    %c0_i32 = arith.constant 0 : i32
    %c0_i32_0 = arith.constant 0 : i32
    %c0_i32_1 = arith.constant 0 : i32
    return %c0_i32, %c0_i32_0 : i32, i32
  }
  func.func @transform_5(%arg0: i32) -> (i32, i32) {
    %c0_i32 = arith.constant 0 : i32
    %c0_i32_0 = arith.constant 0 : i32
    %c0_i32_1 = arith.constant 0 : i32
    return %c0_i32, %c0_i32_0 : i32, i32
  }
  func.func @transform_6(%arg0: i32) -> (i32, i32) {
    %c0_i32 = arith.constant 0 : i32
    %c0_i32_0 = arith.constant 0 : i32
    %c0_i32_1 = arith.constant 0 : i32
    return %c0_i32, %c0_i32_0 : i32, i32
  }
  func.func @transform_7(%arg0: i32) -> (i32, i32) {
    %c0_i32 = arith.constant 0 : i32
    %c0_i32_0 = arith.constant 0 : i32
    %c0_i32_1 = arith.constant 0 : i32
    return %c0_i32, %c0_i32_0 : i32, i32
  }
  func.func @transform_8(%arg0: i32) -> (i32, i32) {
    %c0_i32 = arith.constant 0 : i32
    %c0_i32_0 = arith.constant 0 : i32
    %c0_i32_1 = arith.constant 0 : i32
    return %c0_i32, %c0_i32_0 : i32, i32
  }
  func.func @transform_9(%arg0: i32) -> (i32, i32) {
    %c0_i32 = arith.constant 0 : i32
    %c0_i32_0 = arith.constant 0 : i32
    %c0_i32_1 = arith.constant 0 : i32
    return %c0_i32, %c0_i32_0 : i32, i32
  }
  func.func @transform_10(%arg0: i32) -> (i32, i32) {
    %c0_i32 = arith.constant 0 : i32
    %c0_i32_0 = arith.constant 0 : i32
    %c0_i32_1 = arith.constant 0 : i32
    return %c0_i32, %c0_i32_0 : i32, i32
  }
  func.func @transform_11(%arg0: i32) -> (i32, i32) {
    %c0_i32 = arith.constant 0 : i32
    %c0_i32_0 = arith.constant 0 : i32
    return %arg0, %c0_i32 : i32, i32
  }
}

</mosaic_0001>

<bundles_post_ra>
// kernel: tpu_custom_call.1
= control target key start
LH: loop header
LB: loop body
LE: loop exit
PB: predicated region body
PF: predicated region fallthrough
CT: control target
= control target key end

     0   :  { %16 = vsyncpa [#allocation3], 0  ;;  %s5285_s0 = inlined_call_operand.hbm [shape: bf16[8,128], index: 0, kind: input, shape index: {}]   ;;  %s5286_s1 = inlined_call_operand.hbm [shape: bf16[128,512], index: 1, kind: input, shape index: {}]   ;;  %s5287_s2 = inlined_call_operand.vmem [shape: f32[1,512], index: 2, kind: input, shape index: {}]   ;;  %s5288_s3 = inlined_call_operand.hbm [shape: bf16[512,512], index: 3, kind: input, shape index: {}]   ;;  %s5289_s4 = inlined_call_operand.vmem [shape: f32[1,512], index: 4, kind: input, shape index: {}]   ;;  %s5290_s5 = inlined_call_operand.hbm [shape: bf16[512,512], index: 5, kind: input, shape index: {}]   ;;  %s5291_s6 = inlined_call_operand.vmem [shape: f32[1,512], index: 6, kind: input, shape index: {}]   ;;  %s5292_s7 = inlined_call_operand.hbm [shape: bf16[512,512], index: 7, kind: input, shape index: {}]   ;;  %s5293_s8 = inlined_call_operand.vmem [shape: f32[1,512], index: 8, kind: input, shape index: {}]   ;;  %s5294_s9 = inlined_call_operand.hbm [shape: bf16[512,128], index: 9, kind: input, shape index: {}]   ;;  %s5295_s10 = inlined_call_operand.vmem [shape: f32[1,128], index: 10, kind: input, shape index: {}]   ;;  %s5296_s11 = inlined_call_operand.hbm [shape: f32[8,128], index: 11, kind: output, shape index: {}]  }
   0x1   :  { %17 = vsyncpa [#allocation6], 0 }
   0x2   :  { %18 = vsyncpa [#allocation9], 0 }
   0x3   :  { %19 = vsyncpa [#allocation12], 0 }
   0x4   :  { %20 = vsyncpa [#allocation4], 0  ;;  %s5045_s17 = smov [#allocation5]   ;;  %s4881_s21 = scalar_lea.hbm %s5286_s1, 4096 }
   0x5   :  { %s36_s18 = sshll.u32 %s5045_s17, 4  ;;  %p4882_p0 = scmp.ne.s32.totalorder %s5286_s1, %s4881_s21  ;;  %s37_s18 = int_to_ptr.vmem [resolvable:$true] %s36_s18 }
   0x6   :  { %p4885_p1 = scmp.lt.u32.totalorder %s4881_s21, %s5286_s1 }
   0x8   :  { %p4887_p2 = pnand %p4885_p1, %p4882_p0 }
   0xa   :  { %4890 = shalt.err (!%p4887_p2)
}
   0xb   :  { %s4891_s26 = scalar_lea.vmem %s37_s18, 4096  ;;  %p4896_p4 = scmp.lt.s32.totalorder %s37_s18, %s37_s18 }
   0xc   :  { %p4892_p3 = scmp.ne.s32.totalorder %s37_s18, %s4891_s26  ;;  %p4897_p5 = scmp.lt.s32.totalorder %s4891_s26, %s4891_s26 }
   0xe   :  { %p4898_p6 = por %p4897_p5, %p4896_p4 }
  0x10   :  { %p4899_p7 = pnand %p4898_p6, %p4892_p3 }
  0x12   :  { %4902 = shalt.err (!%p4899_p7)
}
  0x13   :  { %s5046_s27 = smov 256   ;;  %s5047_s28 = smov 16  }
  0x14   :  { %42 = dma.hbm_to_vmem [thread:$0]  %s5286_s1, 4096, %s37_s18, [#allocation6], %s5046_s27, %s5046_s27, %s5047_s28  }
  0x15   :  { %s5048_s12 = smov [#allocation8]   ;;  %s5049_s14 = smov [#allocation2]  }
  0x16   :  { %s64_s13 = sshll.u32 %s5048_s12, 4  ;;  %s27_s15 = sshll.u32 %s5049_s14, 4  ;;  %s65_s13 = int_to_ptr.vmem [resolvable:$true] %s64_s13  ;;  %s28_s15 = int_to_ptr.vmem [resolvable:$true] %s27_s15 }
  0x17   :  { %s4903_s19 = scalar_lea.hbm %s5290_s5, 16384 }
  0x18   :  { %p4904_p8 = scmp.ne.s32.totalorder %s5290_s5, %s4903_s19  ;;  %p4907_p9 = scmp.lt.u32.totalorder %s4903_s19, %s5290_s5 }
  0x1a   :  { %p4909_p10 = pnand %p4907_p9, %p4904_p8 }
  0x1c   :  { %4912 = shalt.err (!%p4909_p10)
}
  0x1d   :  { %s4913_s1 = scalar_lea.vmem %s65_s13, 16384  ;;  %p4918_p12 = scmp.lt.s32.totalorder %s65_s13, %s65_s13 }
  0x1e   :  { %p4914_p11 = scmp.ne.s32.totalorder %s65_s13, %s4913_s1  ;;  %p4919_p13 = scmp.lt.s32.totalorder %s4913_s1, %s4913_s1 }
  0x20   :  { %p4920_p0 = por %p4919_p13, %p4918_p12 }
  0x22   :  { %p4921_p1 = pnand %p4920_p0, %p4914_p11 }
  0x24   :  { %4924 = shalt.err (!%p4921_p1)
}
  0x25   :  { %70 = dma.hbm_to_vmem [thread:$0]  %s5290_s5, 16384, %s65_s13, [#allocation9], %s5046_s27, %s5046_s27, %s5047_s28  }
  0x26   :  { %s4925_s29 = scalar_lea.hbm %s5285_s0, 64 }
  0x27   :  { %p4926_p2 = scmp.ne.s32.totalorder %s5285_s0, %s4925_s29  ;;  %p4929_p3 = scmp.lt.u32.totalorder %s4925_s29, %s5285_s0 }
  0x29   :  { %p4931_p4 = pnand %p4929_p3, %p4926_p2 }
  0x2b   :  { %4934 = shalt.err (!%p4931_p4)
}
  0x2c   :  { %s4935_s17 = scalar_lea.vmem %s28_s15, 64  ;;  %p4940_p6 = scmp.lt.s32.totalorder %s28_s15, %s28_s15 }
  0x2d   :  { %p4936_p5 = scmp.ne.s32.totalorder %s28_s15, %s4935_s17  ;;  %p4941_p7 = scmp.lt.s32.totalorder %s4935_s17, %s4935_s17 }
  0x2f   :  { %p4942_p8 = por %p4941_p7, %p4940_p6 }
  0x31   :  { %p4943_p9 = pnand %p4942_p8, %p4936_p5 }
  0x33   :  { %4946 = shalt.err (!%p4943_p9)
}
  0x34   :  { %30 = dma.hbm_to_vmem [thread:$0]  %s5285_s0, 64, %s28_s15, [#allocation3]  }
  0x35   :  { %s5050_s19 = smov [#allocation7]   ;;  %s5051_s21 = smov [#allocation10]  }
  0x36   :  { %s50_s20 = sshll.u32 %s5050_s19, 4  ;;  %s78_s22 = sshll.u32 %s5051_s21, 4  ;;  %s51_s20 = int_to_ptr.vmem [resolvable:$true] %s50_s20  ;;  %s79_s22 = int_to_ptr.vmem [resolvable:$true] %s78_s22 }
  0x37   :  { %s4947_s18 = scalar_lea.hbm %s5288_s3, 16384 }
  0x38   :  { %p4948_p10 = scmp.ne.s32.totalorder %s5288_s3, %s4947_s18  ;;  %p4951_p11 = scmp.lt.u32.totalorder %s4947_s18, %s5288_s3 }
  0x3a   :  { %p4953_p12 = pnand %p4951_p11, %p4948_p10 }
  0x3c   :  { %4956 = shalt.err (!%p4953_p12)
}
  0x3d   :  { %s4957_s0 = scalar_lea.vmem %s51_s20, 16384  ;;  %p4962_p0 = scmp.lt.s32.totalorder %s51_s20, %s51_s20 }
  0x3e   :  { %p4958_p13 = scmp.ne.s32.totalorder %s51_s20, %s4957_s0  ;;  %p4963_p1 = scmp.lt.s32.totalorder %s4957_s0, %s4957_s0 }
  0x40   :  { %p4964_p2 = por %p4963_p1, %p4962_p0 }
  0x42   :  { %p4965_p3 = pnand %p4964_p2, %p4958_p13 }
  0x44   :  { %4968 = shalt.err (!%p4965_p3)
}
  0x45   :  { %56 = dma.hbm_to_vmem [thread:$0]  %s5288_s3, 16384, %s51_s20, [#allocation6], %s5046_s27, %s5046_s27, %s5047_s28  }
  0x46   :  { %s4969_s16 = scalar_lea.hbm %s5292_s7, 16384 }
  0x47   :  { %p4970_p4 = scmp.ne.s32.totalorder %s5292_s7, %s4969_s16  ;;  %p4973_p5 = scmp.lt.u32.totalorder %s4969_s16, %s5292_s7 }
  0x49   :  { %p4975_p6 = pnand %p4973_p5, %p4970_p4 }
  0x4b   :  { %4978 = shalt.err (!%p4975_p6)
}
  0x4c   :  { %s4979_s21 = scalar_lea.vmem %s79_s22, 16384  ;;  %p4984_p8 = scmp.lt.s32.totalorder %s79_s22, %s79_s22 }
  0x4d   :  { %p4980_p7 = scmp.ne.s32.totalorder %s79_s22, %s4979_s21  ;;  %p4985_p9 = scmp.lt.s32.totalorder %s4979_s21, %s4979_s21 }
  0x4f   :  { %p4986_p10 = por %p4985_p9, %p4984_p8 }
  0x51   :  { %p4987_p11 = pnand %p4986_p10, %p4980_p7 }
  0x53   :  { %4990 = shalt.err (!%p4987_p11)
}
  0x54   :  { %84 = dma.hbm_to_vmem [thread:$0]  %s5292_s7, 16384, %s79_s22, [#allocation9], %s5046_s27, %s5046_s27, %s5047_s28  }
  0x55   :  { %s5052_s23 = smov [#allocation11]   ;;  %s4991_s25 = scalar_lea.hbm %s5294_s9, 4096 }
  0x56   :  { %s92_s1 = sshll.u32 %s5052_s23, 4  ;;  %p4992_p12 = scmp.ne.s32.totalorder %s5294_s9, %s4991_s25  ;;  %s93_s1 = int_to_ptr.vmem [resolvable:$true] %s92_s1 }
  0x57   :  { %p4995_p13 = scmp.lt.u32.totalorder %s4991_s25, %s5294_s9 }
  0x59   :  { %p4997_p0 = pnand %p4995_p13, %p4992_p12 }
  0x5b   :  { %5000 = shalt.err (!%p4997_p0)
}
  0x5c   :  { %s5001_s30 = scalar_lea.vmem %s93_s1, 4096  ;;  %p5006_p2 = scmp.lt.s32.totalorder %s93_s1, %s93_s1 }
  0x5d   :  { %p5002_p1 = scmp.ne.s32.totalorder %s93_s1, %s5001_s30  ;;  %p5007_p3 = scmp.lt.s32.totalorder %s5001_s30, %s5001_s30 }
  0x5f   :  { %p5008_p4 = por %p5007_p3, %p5006_p2 }
  0x61   :  { %p5009_p5 = pnand %p5008_p4, %p5002_p1 }
  0x63   :  { %5012 = shalt.err (!%p5009_p5)
}
  0x64   :  { %s5053_s7 = smov 64   ;;  %s5054_s27 = smov 4  }
  0x65   :  { %98 = dma.hbm_to_vmem [thread:$0]  %s5294_s9, 4096, %s93_s1, [#allocation12], %s5053_s7, %s5053_s7, %s5054_s27  }
  0x66   :  { %5035 = dma.done.wait [#allocation3], 64  }
  0x67   :  { %5036 = vsyncadd [#allocation3], 4294967232 }
  0x68   :  { %5037 = dma.done.wait [#allocation6], 20480  }
  0x69   :  { %5038 = vsyncadd [#allocation6], 4294946816 }
  0x6a   :  { %5039 = dma.done.wait [#allocation9], 32768  }
  0x6b   :  { %5040 = vsyncadd [#allocation9], 4294934528 }
  0x6c   :  { %5041 = dma.done.wait [#allocation12], 4096  }
  0x6d   :  { %5042 = vsyncadd [#allocation12], 4294963200  ;;  %v5055_v0 = vmov 0   ;;  %v4221_v1 = vld [vmem:[#allocation5 + $0x4] ss:$16 sps:$4 sm:$0xff]   ;;  %s5056_s13 = smov [#allocation13]  }
  0x6e   :  { %367 = vmatprep.mubr.bf16.mxu0 %v5055_v0  ;;  %408 = vmatprep.mubr.bf16.mxu1 %v5055_v0  ;;  %v4223_v2 = vld [vmem:[#allocation5] ss:$16 sps:$4 sm:$0xff]   ;;  %v4224_v3 = vld [vmem:[#allocation5 + $0x24] ss:$16 sps:$4 sm:$0xff]   ;;  %v4245_v10 = vld [vmem:[#allocation5 + $0xc] ss:$16 sps:$4 sm:$0xff]  }
  0x6f   :  { %335 = vmatprep.subr.bf16.mxu0 %v4221_v1  ;;  %v4226_v4 = vld [vmem:[#allocation5 + $0x20] ss:$16 sps:$4 sm:$0xff]   ;;  %v4227_v5 = vld [vmem:[#allocation5 + $0x44] ss:$16 sps:$4 sm:$0xff]   ;;  %v4247_v11 = vld [vmem:[#allocation5 + $0x8] ss:$16 sps:$4 sm:$0xff]   ;;  %376 = vmatprep.subr.bf16.mxu1 %v4245_v10 }
  0x70   :  { %336 = vmatpush1.bf16.msra.mxu0 %v4223_v2  ;;  %v4229_v6 = vld [vmem:[#allocation5 + $0x40] ss:$16 sps:$4 sm:$0xff]   ;;  %v4230_v7 = vld [vmem:[#allocation5 + $0x64] ss:$16 sps:$4 sm:$0xff]   ;;  %v4248_v12 = vld [vmem:[#allocation5 + $0x2c] ss:$16 sps:$4 sm:$0xff]   ;;  %377 = vmatpush1.bf16.msra.mxu1 %v4247_v11 }
  0x71   :  { %337 = vmatprep.subr.bf16.mxu0 %v4224_v3  ;;  %v4232_v8 = vld [vmem:[#allocation5 + $0x60] ss:$16 sps:$4 sm:$0xff]   ;;  %v4233_v9 = vld [vmem:[#allocation5 + $0x84] ss:$16 sps:$4 sm:$0xff]   ;;  %v4250_v14 = vld [vmem:[#allocation5 + $0x28] ss:$16 sps:$4 sm:$0xff]   ;;  %378 = vmatprep.subr.bf16.mxu1 %v4248_v12 }
  0x72   :  { %v4235_v13 = vld [vmem:[#allocation5 + $0x80] ss:$16 sps:$4 sm:$0xff]   ;;  %v4251_v15 = vld [vmem:[#allocation5 + $0x4c] ss:$16 sps:$4 sm:$0xff]   ;;  %v4236_v16 = vld [vmem:[#allocation5 + $0xa4] ss:$16 sps:$4 sm:$0xff]  }
  0x73   :  { %v4238_v17 = vld [vmem:[#allocation5 + $0xa0] ss:$16 sps:$4 sm:$0xff]   ;;  %v4253_v18 = vld [vmem:[#allocation5 + $0x48] ss:$16 sps:$4 sm:$0xff]   ;;  %v4254_v19 = vld [vmem:[#allocation5 + $0x6c] ss:$16 sps:$4 sm:$0xff]  }
  0x74   :  { %338 = vmatpush1.bf16.msra.mxu0 %v4226_v4  ;;  %379 = vmatpush1.bf16.msra.mxu1 %v4250_v14  ;;  %v4239_v20 = vld [vmem:[#allocation5 + $0xc4] ss:$16 sps:$4 sm:$0xff]   ;;  %v4241_v21 = vld [vmem:[#allocation5 + $0xc0] ss:$16 sps:$4 sm:$0xff]   ;;  %v4256_v22 = vld [vmem:[#allocation5 + $0x68] ss:$16 sps:$4 sm:$0xff]  }
  0x75   :  { %339 = vmatprep.subr.bf16.mxu0 %v4227_v5  ;;  %380 = vmatprep.subr.bf16.mxu1 %v4251_v15  ;;  %v4257_v23 = vld [vmem:[#allocation5 + $0x8c] ss:$16 sps:$4 sm:$0xff]   ;;  %v4242_v24 = vld [vmem:[#allocation5 + $0xe4] ss:$16 sps:$4 sm:$0xff]   ;;  %v4244_v25 = vld [vmem:[#allocation5 + $0xe0] ss:$16 sps:$4 sm:$0xff]  }
  0x76   :  { %v4259_v26 = vld [vmem:[#allocation5 + $0x88] ss:$16 sps:$4 sm:$0xff]   ;;  %v4260_v27 = vld [vmem:[#allocation5 + $0xac] ss:$16 sps:$4 sm:$0xff]   ;;  %v4271_v28 = vld [vmem:[#allocation7 + $0x4] ss:$16 sps:$4 sm:$0xff]  }
  0x77   :  { %v120_v29 = vld [vmem:[#allocation2] sm:$0xf]  ;;  %v4262_v30 = vld [vmem:[#allocation5 + $0xa8] ss:$16 sps:$4 sm:$0xff]   ;;  %v4269_v32 = vld [vmem:[#allocation7] ss:$16 sps:$4 sm:$0xff]  }
  0x78   :  { %340 = vmatpush1.bf16.msra.mxu0 %v4229_v6  ;;  %381 = vmatpush1.bf16.msra.mxu1 %v4253_v18  ;;  %v4263_v31 = vld [vmem:[#allocation5 + $0xcc] ss:$16 sps:$4 sm:$0xff]   ;;  %v4277_v33 = vld [vmem:[#allocation7 + $0x24] ss:$16 sps:$4 sm:$0xff]   ;;  %v4265_v34 = vld [vmem:[#allocation5 + $0xc8] ss:$16 sps:$4 sm:$0xff]  }
  0x79   :  { %341 = vmatprep.subr.bf16.mxu0 %v4230_v7  ;;  %382 = vmatprep.subr.bf16.mxu1 %v4254_v19  ;;  %v4266_v35 = vld [vmem:[#allocation5 + $0xec] ss:$16 sps:$4 sm:$0xff]   ;;  %v4275_v36 = vld [vmem:[#allocation7 + $0x20] ss:$16 sps:$4 sm:$0xff]   ;;  %v4283_v37 = vld [vmem:[#allocation7 + $0x44] ss:$16 sps:$4 sm:$0xff]  }
  0x7a   :  { %v4268_v38 = vld [vmem:[#allocation5 + $0xe8] ss:$16 sps:$4 sm:$0xff]   ;;  %v4274_v39 = vld [vmem:[#allocation7 + $0xc] ss:$16 sps:$4 sm:$0xff]   ;;  %v4281_v40 = vld [vmem:[#allocation7 + $0x40] ss:$16 sps:$4 sm:$0xff]  }
  0x7b   :  { %v4289_v41 = vld [vmem:[#allocation7 + $0x64] ss:$16 sps:$4 sm:$0xff]   ;;  %v4272_v42 = vld [vmem:[#allocation7 + $0x8] ss:$16 sps:$4 sm:$0xff]   ;;  %v4280_v43 = vld [vmem:[#allocation7 + $0x2c] ss:$16 sps:$4 sm:$0xff]  }
  0x7c   :  { %342 = vmatpush1.bf16.msra.mxu0 %v4232_v8  ;;  %383 = vmatpush1.bf16.msra.mxu1 %v4256_v22  ;;  %v4287_v44 = vld [vmem:[#allocation7 + $0x60] ss:$16 sps:$4 sm:$0xff]   ;;  %v4295_v45 = vld [vmem:[#allocation7 + $0x84] ss:$16 sps:$4 sm:$0xff]   ;;  %v4278_v46 = vld [vmem:[#allocation7 + $0x28] ss:$16 sps:$4 sm:$0xff]  }
  0x7d   :  { %343 = vmatprep.subr.bf16.mxu0 %v4233_v9  ;;  %384 = vmatprep.subr.bf16.mxu1 %v4257_v23  ;;  %v4286_v47 = vld [vmem:[#allocation7 + $0x4c] ss:$16 sps:$4 sm:$0xff]   ;;  %v4293_v48 = vld [vmem:[#allocation7 + $0x80] ss:$16 sps:$4 sm:$0xff]   ;;  %v4301_v49 = vld [vmem:[#allocation7 + $0xa4] ss:$16 sps:$4 sm:$0xff]  }
  0x7e   :  { %v4284_v50 = vld [vmem:[#allocation7 + $0x48] ss:$16 sps:$4 sm:$0xff]   ;;  %v4292_v51 = vld [vmem:[#allocation7 + $0x6c] ss:$16 sps:$4 sm:$0xff]   ;;  %v4299_v52 = vld [vmem:[#allocation7 + $0xa0] ss:$16 sps:$4 sm:$0xff]  }
  0x7f   :  { %v4307_v53 = vld [vmem:[#allocation7 + $0xc4] ss:$16 sps:$4 sm:$0xff]   ;;  %v4290_v54 = vld [vmem:[#allocation7 + $0x68] ss:$16 sps:$4 sm:$0xff]   ;;  %v4298_v55 = vld [vmem:[#allocation7 + $0x8c] ss:$16 sps:$4 sm:$0xff]  }
  0x80   :  { %344 = vmatpush1.bf16.msra.mxu0 %v4235_v13  ;;  %385 = vmatpush1.bf16.msra.mxu1 %v4259_v26  ;;  %v4305_v56 = vld [vmem:[#allocation7 + $0xc0] ss:$16 sps:$4 sm:$0xff]   ;;  %v4313_v57 = vld [vmem:[#allocation7 + $0xe4] ss:$16 sps:$4 sm:$0xff]   ;;  %v4296_v58 = vld [vmem:[#allocation7 + $0x88] ss:$16 sps:$4 sm:$0xff]  }
  0x81   :  { %345 = vmatprep.subr.bf16.mxu0 %v4236_v16  ;;  %386 = vmatprep.subr.bf16.mxu1 %v4260_v27  ;;  %v4304_v59 = vld [vmem:[#allocation7 + $0xac] ss:$16 sps:$4 sm:$0xff]   ;;  %v4311_v60 = vld [vmem:[#allocation7 + $0xe0] ss:$16 sps:$4 sm:$0xff]   ;;  %v4319_v61 = vld [vmem:[#allocation7 + $0x104] ss:$16 sps:$4 sm:$0xff]  }
  0x82   :  { %v4302_v62 = vld [vmem:[#allocation7 + $0xa8] ss:$16 sps:$4 sm:$0xff]   ;;  %v4310_v63 = vld [vmem:[#allocation7 + $0xcc] ss:$16 sps:$4 sm:$0xff]   ;;  %v4317_v0 = vld [vmem:[#allocation7 + $0x100] ss:$16 sps:$4 sm:$0xff]  }
  0x83   :  { %v4325_v1 = vld [vmem:[#allocation7 + $0x124] ss:$16 sps:$4 sm:$0xff]   ;;  %v4308_v2 = vld [vmem:[#allocation7 + $0xc8] ss:$16 sps:$4 sm:$0xff]   ;;  %v4316_v3 = vld [vmem:[#allocation7 + $0xec] ss:$16 sps:$4 sm:$0xff]  }
  0x84   :  { %346 = vmatpush1.bf16.msra.mxu0 %v4238_v17  ;;  %387 = vmatpush1.bf16.msra.mxu1 %v4262_v30  ;;  %v4323_v4 = vld [vmem:[#allocation7 + $0x120] ss:$16 sps:$4 sm:$0xff]   ;;  %v4331_v5 = vld [vmem:[#allocation7 + $0x144] ss:$16 sps:$4 sm:$0xff]   ;;  %v4314_v6 = vld [vmem:[#allocation7 + $0xe8] ss:$16 sps:$4 sm:$0xff]  }
  0x85   :  { %347 = vmatprep.subr.bf16.mxu0 %v4239_v20  ;;  %388 = vmatprep.subr.bf16.mxu1 %v4263_v31  ;;  %v4322_v7 = vld [vmem:[#allocation7 + $0x10c] ss:$16 sps:$4 sm:$0xff]   ;;  %v4329_v8 = vld [vmem:[#allocation7 + $0x140] ss:$16 sps:$4 sm:$0xff]   ;;  %v4337_v9 = vld [vmem:[#allocation7 + $0x164] ss:$16 sps:$4 sm:$0xff]  }
  0x86   :  { %v4320_v10 = vld [vmem:[#allocation7 + $0x108] ss:$16 sps:$4 sm:$0xff]   ;;  %v4328_v11 = vld [vmem:[#allocation7 + $0x12c] ss:$16 sps:$4 sm:$0xff]   ;;  %v4335_v12 = vld [vmem:[#allocation7 + $0x160] ss:$16 sps:$4 sm:$0xff]  }
  0x87   :  { %v4343_v13 = vld [vmem:[#allocation7 + $0x184] ss:$16 sps:$4 sm:$0xff]   ;;  %v4326_v14 = vld [vmem:[#allocation7 + $0x128] ss:$16 sps:$4 sm:$0xff]   ;;  %v4334_v15 = vld [vmem:[#allocation7 + $0x14c] ss:$16 sps:$4 sm:$0xff]  }
  0x88   :  { %348 = vmatpush1.bf16.msra.mxu0 %v4241_v21  ;;  %389 = vmatpush1.bf16.msra.mxu1 %v4265_v34  ;;  %v4341_v16 = vld [vmem:[#allocation7 + $0x180] ss:$16 sps:$4 sm:$0xff]   ;;  %v4349_v17 = vld [vmem:[#allocation7 + $0x1a4] ss:$16 sps:$4 sm:$0xff]   ;;  %v4332_v18 = vld [vmem:[#allocation7 + $0x148] ss:$16 sps:$4 sm:$0xff]  }
  0x89   :  { %349 = vmatprep.subr.bf16.mxu0 %v4242_v24  ;;  %390 = vmatprep.subr.bf16.mxu1 %v4266_v35  ;;  %v4340_v19 = vld [vmem:[#allocation7 + $0x16c] ss:$16 sps:$4 sm:$0xff]   ;;  %v4347_v20 = vld [vmem:[#allocation7 + $0x1a0] ss:$16 sps:$4 sm:$0xff]   ;;  %v4338_v21 = vld [vmem:[#allocation7 + $0x168] ss:$16 sps:$4 sm:$0xff]  }
  0x8a   :  { %v4346_v22 = vld [vmem:[#allocation7 + $0x18c] ss:$16 sps:$4 sm:$0xff]   ;;  %v4344_v23 = vld [vmem:[#allocation7 + $0x188] ss:$16 sps:$4 sm:$0xff]   ;;  %v4355_v26 = vld [vmem:[#allocation7 + $0x1c4] ss:$16 sps:$4 sm:$0xff]  }
  0x8b   :  { %v4352_v24 = vld [vmem:[#allocation7 + $0x1ac] ss:$16 sps:$4 sm:$0xff]   ;;  %v4361_v30 = vld [vmem:[#allocation7 + $0x1e4] ss:$16 sps:$4 sm:$0xff]   ;;  %s3667_s19 = sshll.u32 %s5056_s13, 4  ;;  %s3668_s19 = int_to_ptr.vmem [resolvable:$true] %s3667_s19 }
  0x8c   :  { %350 = vmatpush1.bf16.msra.mxu0 %v4244_v25  ;;  %391 = vmatpush1.bf16.msra.mxu1 %v4268_v38  ;;  %v4350_v25 = vld [vmem:[#allocation7 + $0x1a8] ss:$16 sps:$4 sm:$0xff]   ;;  %v4358_v27 = vld [vmem:[#allocation7 + $0x1cc] ss:$16 sps:$4 sm:$0xff]   ;;  %v4367_v34 = vld [vmem:[#allocation7 + $0x204] ss:$16 sps:$4 sm:$0xff]   ;;  %p5018_p7 = scmp.lt.s32.totalorder %s3668_s19, %s3668_s19 }
  0x8d   :  { %1215 = vmatprep.subr.bf16.mxu0 %v4271_v28  ;;  %1297 = vmatprep.subr.bf16.mxu1 %v4274_v39  ;;  %v4353_v28 = vld [vmem:[#allocation7 + $0x1c0] ss:$16 sps:$4 sm:$0xff]   ;;  %v4364_v31 = vld [vmem:[#allocation7 + $0x1ec] ss:$16 sps:$4 sm:$0xff]  }
  0x8e   :  { %v4370_v35 = vld [vmem:[#allocation7 + $0x20c] ss:$16 sps:$4 sm:$0xff]  }
  0x8f   :  { %368 = vmatmul.mubr.bf16.vlgmr.msra.gmra.mrb[0].mxu0 %v120_v29  ;;  %409 = vmatmul.mubr.bf16.vlgmr.msra.gmra.mrb[0].mxu1 %v120_v29  ;;  %v4356_v29 = vld [vmem:[#allocation7 + $0x1c8] ss:$16 sps:$4 sm:$0xff]   ;;  %v5209_v39 = vld [vmem:[%s5287_s2] sm:$0xf] }
  0x90   :  { %1216 = vmatpush1.bf16.msra.mxu0 %v4269_v32  ;;  %1298 = vmatpush1.bf16.msra.mxu1 %v4272_v42  ;;  %v4359_v32 = vld [vmem:[#allocation7 + $0x1e0] ss:$16 sps:$4 sm:$0xff]  }
  0x91   :  { %1217 = vmatprep.subr.bf16.mxu0 %v4277_v33  ;;  %1299 = vmatprep.subr.bf16.mxu1 %v4280_v43  ;;  %v4362_v33 = vld [vmem:[#allocation7 + $0x1e8] ss:$16 sps:$4 sm:$0xff]  }
  0x94   :  { %1218 = vmatpush1.bf16.msra.mxu0 %v4275_v36  ;;  %1300 = vmatpush1.bf16.msra.mxu1 %v4278_v46  ;;  %v155_v36 = vlaneseq }
  0x95   :  { %1219 = vmatprep.subr.bf16.mxu0 %v4283_v37  ;;  %1301 = vmatprep.subr.bf16.mxu1 %v4286_v47 }
  0x96   :  { %v5201_v37 = vshrl.u32 %v155_v36, 7  ;;  %v4427_v36 = vld [vmem:[#allocation7 + $0x344] ss:$16 sps:$4 sm:$0xff]  }
  0x98   :  { %1220 = vmatpush1.bf16.msra.mxu0 %v4281_v40  ;;  %1302 = vmatpush1.bf16.msra.mxu1 %v4284_v50  ;;  %v5204_v38 = vsub.s32 0, %v5201_v37  ;;  %v5212_v40 = vsub.s32 1, %v5201_v37 }
  0x99   :  { %1221 = vmatprep.subr.bf16.mxu0 %v4289_v41  ;;  %1303 = vmatprep.subr.bf16.mxu1 %v4292_v51  ;;  %v5219_v51 = vsub.s32 3, %v5201_v37 }
  0x9a   :  { %v158_v41 = vrot.slane %v5209_v39, %v5204_v38  ;;  %v162_v42 = vrot.slane %v5209_v39, %v5212_v40 }
  0x9c   :  { %1222 = vmatpush1.bf16.msra.mxu0 %v4287_v44  ;;  %1304 = vmatpush1.bf16.msra.mxu1 %v4290_v54  ;;  %v4368_v54 = vld [vmem:[#allocation7 + $0x208] ss:$16 sps:$4 sm:$0xff]  }
  0x9d   :  { %1223 = vmatprep.subr.bf16.mxu0 %v4295_v45  ;;  %1305 = vmatprep.subr.bf16.mxu1 %v4298_v55 }
  0xa0   :  { %1224 = vmatpush1.bf16.msra.mxu0 %v4293_v48  ;;  %1306 = vmatpush1.bf16.msra.mxu1 %v4296_v58  ;;  %v170_v58 = vrot.slane %v5209_v39, %v5219_v51 }
  0xa1   :  { %1225 = vmatprep.subr.bf16.mxu0 %v4301_v49  ;;  %1307 = vmatprep.subr.bf16.mxu1 %v4304_v59  ;;  %v4371_v59 = vld [vmem:[#allocation7 + $0x220] ss:$16 sps:$4 sm:$0xff]  }
  0xa4   :  { %1226 = vmatpush1.bf16.msra.mxu0 %v4299_v52  ;;  %1308 = vmatpush1.bf16.msra.mxu1 %v4302_v62  ;;  %v4382_v62 = vld [vmem:[#allocation7 + $0x24c] ss:$16 sps:$4 sm:$0xff]  }
  0xa5   :  { %1227 = vmatprep.subr.bf16.mxu0 %v4307_v53  ;;  %1309 = vmatprep.subr.bf16.mxu1 %v4310_v63  ;;  %v4365_v53 = vld [vmem:[#allocation7 + $0x200] ss:$16 sps:$4 sm:$0xff]  }
  0xa8   :  { %1228 = vmatpush1.bf16.msra.mxu0 %v4305_v56  ;;  %1310 = vmatpush1.bf16.msra.mxu1 %v4308_v2  ;;  %v4373_v56 = vld [vmem:[#allocation7 + $0x224] ss:$16 sps:$4 sm:$0xff]  }
  0xa9   :  { %1229 = vmatprep.subr.bf16.mxu0 %v4313_v57  ;;  %1311 = vmatprep.subr.bf16.mxu1 %v4316_v3  ;;  %v4376_v57 = vld [vmem:[#allocation7 + $0x22c] ss:$16 sps:$4 sm:$0xff]   ;;  %v4377_v3 = vld [vmem:[#allocation7 + $0x240] ss:$16 sps:$4 sm:$0xff]  }
  0xac   :  { %1230 = vmatpush1.bf16.msra.mxu0 %v4311_v60  ;;  %1312 = vmatpush1.bf16.msra.mxu1 %v4314_v6  ;;  %v4374_v60 = vld [vmem:[#allocation7 + $0x228] ss:$16 sps:$4 sm:$0xff]   ;;  %v4385_v6 = vld [vmem:[#allocation7 + $0x264] ss:$16 sps:$4 sm:$0xff]  }
  0xad   :  { %1231 = vmatprep.subr.bf16.mxu0 %v4319_v61  ;;  %1313 = vmatprep.subr.bf16.mxu1 %v4322_v7  ;;  %v4379_v61 = vld [vmem:[#allocation7 + $0x244] ss:$16 sps:$4 sm:$0xff]   ;;  %v4388_v7 = vld [vmem:[#allocation7 + $0x26c] ss:$16 sps:$4 sm:$0xff]  }
  0xb0   :  { %1232 = vmatpush1.bf16.msra.mxu0 %v4317_v0  ;;  %1314 = vmatpush1.bf16.msra.mxu1 %v4320_v10  ;;  %v4383_v10 = vld [vmem:[#allocation7 + $0x260] ss:$16 sps:$4 sm:$0xff]  }
  0xb1   :  { %1233 = vmatprep.subr.bf16.mxu0 %v4325_v1  ;;  %1315 = vmatprep.subr.bf16.mxu1 %v4328_v11  ;;  %v4386_v11 = vld [vmem:[#allocation7 + $0x268] ss:$16 sps:$4 sm:$0xff]  }
  0xb4   :  { %1234 = vmatpush1.bf16.msra.mxu0 %v4323_v4  ;;  %1316 = vmatpush1.bf16.msra.mxu1 %v4326_v14  ;;  %v4380_v4 = vld [vmem:[#allocation7 + $0x248] ss:$16 sps:$4 sm:$0xff]   ;;  %v4389_v14 = vld [vmem:[#allocation7 + $0x280] ss:$16 sps:$4 sm:$0xff]  }
  0xb5   :  { %1235 = vmatprep.subr.bf16.mxu0 %v4331_v5  ;;  %1317 = vmatprep.subr.bf16.mxu1 %v4334_v15  ;;  %v4392_v15 = vld [vmem:[#allocation7 + $0x288] ss:$16 sps:$4 sm:$0xff]  }
  0xb8   :  { %1236 = vmatpush1.bf16.msra.mxu0 %v4329_v8  ;;  %1318 = vmatpush1.bf16.msra.mxu1 %v4332_v18  ;;  %v4395_v18 = vld [vmem:[#allocation7 + $0x2a0] ss:$16 sps:$4 sm:$0xff]  }
  0xb9   :  { %1237 = vmatprep.subr.bf16.mxu0 %v4337_v9  ;;  %1319 = vmatprep.subr.bf16.mxu1 %v4340_v19  ;;  %v4398_v19 = vld [vmem:[#allocation7 + $0x2a8] ss:$16 sps:$4 sm:$0xff]  }
  0xbc   :  { %1238 = vmatpush1.bf16.msra.mxu0 %v4335_v12  ;;  %1320 = vmatpush1.bf16.msra.mxu1 %v4338_v21  ;;  %v4391_v12 = vld [vmem:[#allocation7 + $0x284] ss:$16 sps:$4 sm:$0xff]   ;;  %v4406_v21 = vld [vmem:[#allocation7 + $0x2cc] ss:$16 sps:$4 sm:$0xff]  }
  0xbd   :  { %1239 = vmatprep.subr.bf16.mxu0 %v4343_v13  ;;  %1321 = vmatprep.subr.bf16.mxu1 %v4346_v22  ;;  %v4394_v13 = vld [vmem:[#allocation7 + $0x28c] ss:$16 sps:$4 sm:$0xff]   ;;  %v4401_v22 = vld [vmem:[#allocation7 + $0x2c0] ss:$16 sps:$4 sm:$0xff]  }
  0xc0   :  { %1240 = vmatpush1.bf16.msra.mxu0 %v4341_v16  ;;  %1322 = vmatpush1.bf16.msra.mxu1 %v4344_v23  ;;  %v4397_v16 = vld [vmem:[#allocation7 + $0x2a4] ss:$16 sps:$4 sm:$0xff]   ;;  %v4404_v23 = vld [vmem:[#allocation7 + $0x2c8] ss:$16 sps:$4 sm:$0xff]  }
  0xc1   :  { %1241 = vmatprep.subr.bf16.mxu0 %v4349_v17  ;;  %1323 = vmatprep.subr.bf16.mxu1 %v4352_v24  ;;  %v4400_v17 = vld [vmem:[#allocation7 + $0x2ac] ss:$16 sps:$4 sm:$0xff]   ;;  %v4409_v24 = vld [vmem:[#allocation7 + $0x2e4] ss:$16 sps:$4 sm:$0xff]  }
  0xc4   :  { %1242 = vmatpush1.bf16.msra.mxu0 %v4347_v20  ;;  %1324 = vmatpush1.bf16.msra.mxu1 %v4350_v25  ;;  %v4403_v20 = vld [vmem:[#allocation7 + $0x2c4] ss:$16 sps:$4 sm:$0xff]   ;;  %v4412_v25 = vld [vmem:[#allocation7 + $0x2ec] ss:$16 sps:$4 sm:$0xff]  }
  0xc5   :  { %1243 = vmatprep.subr.bf16.mxu0 %v4355_v26  ;;  %1325 = vmatprep.subr.bf16.mxu1 %v4358_v27  ;;  %v4407_v26 = vld [vmem:[#allocation7 + $0x2e0] ss:$16 sps:$4 sm:$0xff]   ;;  %v4410_v27 = vld [vmem:[#allocation7 + $0x2e8] ss:$16 sps:$4 sm:$0xff]  }
  0xc8   :  { %1244 = vmatpush1.bf16.msra.mxu0 %v4353_v28  ;;  %1326 = vmatpush1.bf16.msra.mxu1 %v4356_v29  ;;  %v4415_v28 = vld [vmem:[#allocation7 + $0x304] ss:$16 sps:$4 sm:$0xff]   ;;  %v4418_v29 = vld [vmem:[#allocation7 + $0x30c] ss:$16 sps:$4 sm:$0xff]  }
  0xc9   :  { %1245 = vmatprep.subr.bf16.mxu0 %v4361_v30  ;;  %1327 = vmatprep.subr.bf16.mxu1 %v4364_v31  ;;  %v4413_v30 = vld [vmem:[#allocation7 + $0x300] ss:$16 sps:$4 sm:$0xff]   ;;  %v4416_v31 = vld [vmem:[#allocation7 + $0x308] ss:$16 sps:$4 sm:$0xff]  }
  0xcc   :  { %1246 = vmatpush1.bf16.msra.mxu0 %v4359_v32  ;;  %1328 = vmatpush1.bf16.msra.mxu1 %v4362_v33  ;;  %v4421_v32 = vld [vmem:[#allocation7 + $0x324] ss:$16 sps:$4 sm:$0xff]   ;;  %v4424_v33 = vld [vmem:[#allocation7 + $0x32c] ss:$16 sps:$4 sm:$0xff]  }
  0xcd   :  { %1256 = vmatprep.subr.bf16.mxu0 %v4367_v34  ;;  %1338 = vmatprep.subr.bf16.mxu1 %v4370_v35  ;;  %v4419_v34 = vld [vmem:[#allocation7 + $0x320] ss:$16 sps:$4 sm:$0xff]   ;;  %v4422_v35 = vld [vmem:[#allocation7 + $0x328] ss:$16 sps:$4 sm:$0xff]  }
 0x162   :  { %v369_v43 = vpop.f32.mrb[0].mxu0  ;;  %v5223_v63 = vpop.f32.mrb[0].mxu1 }
 0x163   :  { %v370_v44 = vadd.f32 %v369_v43, %v158_v41  ;;  %v371_v45 = vpop.f32.mrb[1].mxu0  ;;  %v412_v0 = vpop.f32.mrb[1].mxu1  ;;  %v4430_v41 = vld [vmem:[#allocation7 + $0x34c] ss:$16 sps:$4 sm:$0xff]   ;;  %v4428_v43 = vld [vmem:[#allocation7 + $0x348] ss:$16 sps:$4 sm:$0xff]  }
 0x164   :  { %v372_v46 = vadd.f32 %v371_v45, %v162_v42  ;;  %v373_v47 = vpop.f32.mrb[2].mxu0  ;;  %v413_v1 = vadd.f32 %v412_v0, %v170_v58  ;;  %v414_v2 = vpop.f32.mrb[2].mxu1  ;;  %v4425_v42 = vld [vmem:[#allocation7 + $0x340] ss:$16 sps:$4 sm:$0xff]   ;;  %v4436_v45 = vld [vmem:[#allocation7 + $0x36c] ss:$16 sps:$4 sm:$0xff]  }
 0x165   :  { %v417_v48 = vmax.f32 %v370_v44, 0.0  ;;  %v374_v49 = vpop.f32.mrb[3].mxu0  ;;  %v415_v5 = vpop.f32.mrb[3].mxu1  ;;  %v4433_v44 = vld [vmem:[#allocation7 + $0x364] ss:$16 sps:$4 sm:$0xff]  }
 0x166   :  { %v418_v50 = vmax.f32 %v372_v46, 0.0  ;;  %v420_v8 = vmax.f32 %v413_v1, 0.0  ;;  %v4431_v46 = vld [vmem:[#allocation7 + $0x360] ss:$16 sps:$4 sm:$0xff]   ;;  %v4434_v47 = vld [vmem:[#allocation7 + $0x368] ss:$16 sps:$4 sm:$0xff]  }
 0x167   :  { %v421_v55 = vpack.c.bf16 %v417_v48, %v417_v48  ;;  %v4439_v48 = vld [vmem:[#allocation7 + $0x384] ss:$16 sps:$4 sm:$0xff]   ;;  %v4442_v49 = vld [vmem:[#allocation7 + $0x38c] ss:$16 sps:$4 sm:$0xff]   ;;  %v4455_v2 = vld [vmem:[#allocation7 + $0x3e0] ss:$16 sps:$4 sm:$0xff]  }
 0x168   :  { %v422_v52 = vpack.c.bf16 %v418_v50, %v418_v50  ;;  %v424_v9 = vpack.c.bf16 %v420_v8, %v420_v8  ;;  %v4437_v50 = vld [vmem:[#allocation7 + $0x380] ss:$16 sps:$4 sm:$0xff]   ;;  %v4457_v0 = vld [vmem:[#allocation7 + $0x3e4] ss:$16 sps:$4 sm:$0xff]   ;;  %v4460_v1 = vld [vmem:[#allocation7 + $0x3ec] ss:$16 sps:$4 sm:$0xff]  }
 0x169   :  { %v4466_v5 = vld [vmem:[#allocation8 + $0xc] ss:$16 sps:$4 sm:$0xff]  }
 0x16a   :  { %1247 = vmatprep.mubr.bf16.mxu0 %v422_v52  ;;  %1329 = vmatprep.mubr.bf16.mxu1 %v422_v52  ;;  %v4440_v52 = vld [vmem:[#allocation7 + $0x388] ss:$16 sps:$4 sm:$0xff]  }
 0x16b   :  { %1248 = vmatmul.mubr.bf16.vlgmr.msra.gmra.mrb[4].mxu0 %v421_v55  ;;  %1330 = vmatmul.mubr.bf16.vlgmr.msra.gmra.mrb[4].mxu1 %v421_v55  ;;  %v4448_v55 = vld [vmem:[#allocation7 + $0x3ac] ss:$16 sps:$4 sm:$0xff]  }
 0x16c   :  { %1257 = vmatpush1.bf16.msra.mxu0 %v4365_v53  ;;  %1339 = vmatpush1.bf16.msra.mxu1 %v4368_v54  ;;  %v5226_v53 = vsub.s32 2, %v5201_v37  ;;  %v4445_v54 = vld [vmem:[#allocation7 + $0x3a4] ss:$16 sps:$4 sm:$0xff]  }
 0x16d   :  { %1258 = vmatprep.subr.bf16.mxu0 %v4373_v56  ;;  %1340 = vmatprep.subr.bf16.mxu1 %v4376_v57  ;;  %v4443_v56 = vld [vmem:[#allocation7 + $0x3a0] ss:$16 sps:$4 sm:$0xff]   ;;  %v4446_v57 = vld [vmem:[#allocation7 + $0x3a8] ss:$16 sps:$4 sm:$0xff]  }
 0x16e   :  { %1288 = vmatprep.mubr.bf16.mxu0 %v424_v9  ;;  %1370 = vmatprep.mubr.bf16.mxu1 %v424_v9  ;;  %v166_v58 = vrot.slane %v5209_v39, %v5226_v53  ;;  %v4463_v39 = vld [vmem:[#allocation8 + $0x4] ss:$16 sps:$4 sm:$0xff]   ;;  %v4472_v9 = vld [vmem:[#allocation8 + $0x2c] ss:$16 sps:$4 sm:$0xff]  }
 0x170   :  { %1259 = vmatpush1.bf16.msra.mxu0 %v4371_v59  ;;  %1341 = vmatpush1.bf16.msra.mxu1 %v4374_v60  ;;  %v4451_v59 = vld [vmem:[#allocation7 + $0x3c4] ss:$16 sps:$4 sm:$0xff]   ;;  %v4454_v60 = vld [vmem:[#allocation7 + $0x3cc] ss:$16 sps:$4 sm:$0xff]   ;;  %v411_v37 = vadd.f32 %v5223_v63, %v166_v58 }
 0x171   :  { %1260 = vmatprep.subr.bf16.mxu0 %v4379_v61  ;;  %1342 = vmatprep.subr.bf16.mxu1 %v4382_v62  ;;  %v4449_v61 = vld [vmem:[#allocation7 + $0x3c0] ss:$16 sps:$4 sm:$0xff]   ;;  %v4452_v62 = vld [vmem:[#allocation7 + $0x3c8] ss:$16 sps:$4 sm:$0xff]   ;;  %v4469_v63 = vld [vmem:[#allocation8 + $0x24] ss:$16 sps:$4 sm:$0xff]  }
 0x172   :  { %v4535_v58 = vld [vmem:[#allocation8 + $0x184] ss:$16 sps:$4 sm:$0xff]  }
 0x174   :  { %1261 = vmatpush1.bf16.msra.mxu0 %v4377_v3  ;;  %1343 = vmatpush1.bf16.msra.mxu1 %v4380_v4  ;;  %v4458_v3 = vld [vmem:[#allocation7 + $0x3e8] ss:$16 sps:$4 sm:$0xff]   ;;  %v419_v4 = vmax.f32 %v411_v37, 0.0  ;;  %v4544_v37 = vld [vmem:[#allocation8 + $0x1ac] ss:$16 sps:$4 sm:$0xff]  }
 0x175   :  { %1262 = vmatprep.subr.bf16.mxu0 %v4385_v6  ;;  %1344 = vmatprep.subr.bf16.mxu1 %v4388_v7  ;;  %v4461_v6 = vld [vmem:[#allocation8] ss:$16 sps:$4 sm:$0xff]   ;;  %v4464_v7 = vld [vmem:[#allocation8 + $0x8] ss:$16 sps:$4 sm:$0xff]  }
 0x176   :  { %v423_v8 = vpack.c.bf16 %v419_v4, %v419_v4  ;;  %v4545_v4 = vld [vmem:[#allocation8 + $0x1c0] ss:$16 sps:$4 sm:$0xff]  }
 0x178   :  { %1263 = vmatpush1.bf16.msra.mxu0 %v4383_v10  ;;  %1345 = vmatpush1.bf16.msra.mxu1 %v4386_v11  ;;  %v4467_v10 = vld [vmem:[#allocation8 + $0x20] ss:$16 sps:$4 sm:$0xff]   ;;  %v4470_v11 = vld [vmem:[#allocation8 + $0x28] ss:$16 sps:$4 sm:$0xff]  }
 0x179   :  { %1264 = vmatprep.subr.bf16.mxu0 %v4391_v12  ;;  %1346 = vmatprep.subr.bf16.mxu1 %v4394_v13  ;;  %v4475_v12 = vld [vmem:[#allocation8 + $0x44] ss:$16 sps:$4 sm:$0xff]   ;;  %v4478_v13 = vld [vmem:[#allocation8 + $0x4c] ss:$16 sps:$4 sm:$0xff]  }
 0x17c   :  { %1265 = vmatpush1.bf16.msra.mxu0 %v4389_v14  ;;  %1347 = vmatpush1.bf16.msra.mxu1 %v4392_v15  ;;  %v4473_v14 = vld [vmem:[#allocation8 + $0x40] ss:$16 sps:$4 sm:$0xff]   ;;  %v4476_v15 = vld [vmem:[#allocation8 + $0x48] ss:$16 sps:$4 sm:$0xff]  }
 0x17d   :  { %1266 = vmatprep.subr.bf16.mxu0 %v4397_v16  ;;  %1348 = vmatprep.subr.bf16.mxu1 %v4400_v17  ;;  %v4481_v16 = vld [vmem:[#allocation8 + $0x64] ss:$16 sps:$4 sm:$0xff]   ;;  %v4484_v17 = vld [vmem:[#allocation8 + $0x6c] ss:$16 sps:$4 sm:$0xff]  }
 0x180   :  { %1267 = vmatpush1.bf16.msra.mxu0 %v4395_v18  ;;  %1349 = vmatpush1.bf16.msra.mxu1 %v4398_v19  ;;  %v4479_v18 = vld [vmem:[#allocation8 + $0x60] ss:$16 sps:$4 sm:$0xff]   ;;  %v4482_v19 = vld [vmem:[#allocation8 + $0x68] ss:$16 sps:$4 sm:$0xff]  }
 0x181   :  { %1268 = vmatprep.subr.bf16.mxu0 %v4403_v20  ;;  %1350 = vmatprep.subr.bf16.mxu1 %v4406_v21  ;;  %v4487_v20 = vld [vmem:[#allocation8 + $0x84] ss:$16 sps:$4 sm:$0xff]   ;;  %v4490_v21 = vld [vmem:[#allocation8 + $0x8c] ss:$16 sps:$4 sm:$0xff]  }
 0x184   :  { %1269 = vmatpush1.bf16.msra.mxu0 %v4401_v22  ;;  %1351 = vmatpush1.bf16.msra.mxu1 %v4404_v23  ;;  %v4485_v22 = vld [vmem:[#allocation8 + $0x80] ss:$16 sps:$4 sm:$0xff]   ;;  %v4488_v23 = vld [vmem:[#allocation8 + $0x88] ss:$16 sps:$4 sm:$0xff]  }
 0x185   :  { %1270 = vmatprep.subr.bf16.mxu0 %v4409_v24  ;;  %1352 = vmatprep.subr.bf16.mxu1 %v4412_v25  ;;  %v4493_v24 = vld [vmem:[#allocation8 + $0xa4] ss:$16 sps:$4 sm:$0xff]   ;;  %v4496_v25 = vld [vmem:[#allocation8 + $0xac] ss:$16 sps:$4 sm:$0xff]  }
 0x188   :  { %1271 = vmatpush1.bf16.msra.mxu0 %v4407_v26  ;;  %1353 = vmatpush1.bf16.msra.mxu1 %v4410_v27  ;;  %v4491_v26 = vld [vmem:[#allocation8 + $0xa0] ss:$16 sps:$4 sm:$0xff]   ;;  %v4494_v27 = vld [vmem:[#allocation8 + $0xa8] ss:$16 sps:$4 sm:$0xff]  }
 0x189   :  { %1272 = vmatprep.subr.bf16.mxu0 %v4415_v28  ;;  %1354 = vmatprep.subr.bf16.mxu1 %v4418_v29  ;;  %v4499_v28 = vld [vmem:[#allocation8 + $0xc4] ss:$16 sps:$4 sm:$0xff]   ;;  %v4502_v29 = vld [vmem:[#allocation8 + $0xcc] ss:$16 sps:$4 sm:$0xff]  }
 0x18c   :  { %1273 = vmatpush1.bf16.msra.mxu0 %v4413_v30  ;;  %1355 = vmatpush1.bf16.msra.mxu1 %v4416_v31  ;;  %v4497_v30 = vld [vmem:[#allocation8 + $0xc0] ss:$16 sps:$4 sm:$0xff]   ;;  %v4500_v31 = vld [vmem:[#allocation8 + $0xc8] ss:$16 sps:$4 sm:$0xff]  }
 0x18d   :  { %1274 = vmatprep.subr.bf16.mxu0 %v4421_v32  ;;  %1356 = vmatprep.subr.bf16.mxu1 %v4424_v33  ;;  %v4505_v32 = vld [vmem:[#allocation8 + $0xe4] ss:$16 sps:$4 sm:$0xff]   ;;  %v4508_v33 = vld [vmem:[#allocation8 + $0xec] ss:$16 sps:$4 sm:$0xff]  }
 0x190   :  { %1275 = vmatpush1.bf16.msra.mxu0 %v4419_v34  ;;  %1357 = vmatpush1.bf16.msra.mxu1 %v4422_v35  ;;  %v4503_v34 = vld [vmem:[#allocation8 + $0xe0] ss:$16 sps:$4 sm:$0xff]   ;;  %v4506_v35 = vld [vmem:[#allocation8 + $0xe8] ss:$16 sps:$4 sm:$0xff]  }
 0x191   :  { %1276 = vmatprep.subr.bf16.mxu0 %v4427_v36  ;;  %1358 = vmatprep.subr.bf16.mxu1 %v4430_v41  ;;  %v4511_v36 = vld [vmem:[#allocation8 + $0x104] ss:$16 sps:$4 sm:$0xff]   ;;  %v4514_v41 = vld [vmem:[#allocation8 + $0x10c] ss:$16 sps:$4 sm:$0xff]  }
 0x194   :  { %1277 = vmatpush1.bf16.msra.mxu0 %v4425_v42  ;;  %1359 = vmatpush1.bf16.msra.mxu1 %v4428_v43  ;;  %v4509_v42 = vld [vmem:[#allocation8 + $0x100] ss:$16 sps:$4 sm:$0xff]   ;;  %v4512_v43 = vld [vmem:[#allocation8 + $0x108] ss:$16 sps:$4 sm:$0xff]  }
 0x195   :  { %1278 = vmatprep.subr.bf16.mxu0 %v4433_v44  ;;  %1360 = vmatprep.subr.bf16.mxu1 %v4436_v45  ;;  %v4517_v44 = vld [vmem:[#allocation8 + $0x124] ss:$16 sps:$4 sm:$0xff]   ;;  %v4520_v45 = vld [vmem:[#allocation8 + $0x12c] ss:$16 sps:$4 sm:$0xff]  }
 0x198   :  { %1279 = vmatpush1.bf16.msra.mxu0 %v4431_v46  ;;  %1361 = vmatpush1.bf16.msra.mxu1 %v4434_v47  ;;  %v4515_v46 = vld [vmem:[#allocation8 + $0x120] ss:$16 sps:$4 sm:$0xff]   ;;  %v4518_v47 = vld [vmem:[#allocation8 + $0x128] ss:$16 sps:$4 sm:$0xff]  }
 0x199   :  { %1280 = vmatprep.subr.bf16.mxu0 %v4439_v48  ;;  %1362 = vmatprep.subr.bf16.mxu1 %v4442_v49  ;;  %v4523_v48 = vld [vmem:[#allocation8 + $0x144] ss:$16 sps:$4 sm:$0xff]   ;;  %v4526_v49 = vld [vmem:[#allocation8 + $0x14c] ss:$16 sps:$4 sm:$0xff]  }
 0x19c   :  { %1281 = vmatpush1.bf16.msra.mxu0 %v4437_v50  ;;  %1363 = vmatpush1.bf16.msra.mxu1 %v4440_v52  ;;  %v4521_v50 = vld [vmem:[#allocation8 + $0x140] ss:$16 sps:$4 sm:$0xff]   ;;  %v4524_v52 = vld [vmem:[#allocation8 + $0x148] ss:$16 sps:$4 sm:$0xff]  }
 0x19d   :  { %1282 = vmatprep.subr.bf16.mxu0 %v4445_v54  ;;  %1364 = vmatprep.subr.bf16.mxu1 %v4448_v55  ;;  %v4529_v54 = vld [vmem:[#allocation8 + $0x164] ss:$16 sps:$4 sm:$0xff]   ;;  %v4532_v55 = vld [vmem:[#allocation8 + $0x16c] ss:$16 sps:$4 sm:$0xff]  }
 0x1a0   :  { %1283 = vmatpush1.bf16.msra.mxu0 %v4443_v56  ;;  %1365 = vmatpush1.bf16.msra.mxu1 %v4446_v57  ;;  %v4527_v56 = vld [vmem:[#allocation8 + $0x160] ss:$16 sps:$4 sm:$0xff]   ;;  %v4530_v57 = vld [vmem:[#allocation8 + $0x168] ss:$16 sps:$4 sm:$0xff]  }
 0x1a1   :  { %1284 = vmatprep.subr.bf16.mxu0 %v4451_v59  ;;  %1366 = vmatprep.subr.bf16.mxu1 %v4454_v60  ;;  %v4538_v59 = vld [vmem:[#allocation8 + $0x18c] ss:$16 sps:$4 sm:$0xff]   ;;  %v4533_v60 = vld [vmem:[#allocation8 + $0x180] ss:$16 sps:$4 sm:$0xff]  }
 0x1a4   :  { %1285 = vmatpush1.bf16.msra.mxu0 %v4449_v61  ;;  %1367 = vmatpush1.bf16.msra.mxu1 %v4452_v62  ;;  %v4536_v61 = vld [vmem:[#allocation8 + $0x188] ss:$16 sps:$4 sm:$0xff]   ;;  %v4541_v62 = vld [vmem:[#allocation8 + $0x1a4] ss:$16 sps:$4 sm:$0xff]  }
 0x1a5   :  { %1286 = vmatprep.subr.bf16.mxu0 %v4457_v0  ;;  %1368 = vmatprep.subr.bf16.mxu1 %v4460_v1  ;;  %v4539_v0 = vld [vmem:[#allocation8 + $0x1a0] ss:$16 sps:$4 sm:$0xff]   ;;  %v4542_v1 = vld [vmem:[#allocation8 + $0x1a8] ss:$16 sps:$4 sm:$0xff]  }
 0x1a8   :  { %1287 = vmatpush1.bf16.msra.mxu0 %v4455_v2  ;;  %1369 = vmatpush1.bf16.msra.mxu1 %v4458_v3  ;;  %v4547_v2 = vld [vmem:[#allocation8 + $0x1c4] ss:$16 sps:$4 sm:$0xff]   ;;  %v4550_v3 = vld [vmem:[#allocation8 + $0x1cc] ss:$16 sps:$4 sm:$0xff]  }
 0x1a9   :  { %2177 = vmatprep.subr.bf16.mxu0 %v4463_v39  ;;  %2259 = vmatprep.subr.bf16.mxu1 %v4466_v5  ;;  %v4548_v39 = vld [vmem:[#allocation8 + $0x1c8] ss:$16 sps:$4 sm:$0xff]   ;;  %v4553_v5 = vld [vmem:[#allocation8 + $0x1e4] ss:$16 sps:$4 sm:$0xff]  }
 0x1ab   :  { %1289 = vmatmul.mubr.bf16.vlgmr.msra.gmra.mrb[4].mxu0 %v423_v8  ;;  %1371 = vmatmul.mubr.bf16.vlgmr.msra.gmra.mrb[4].mxu1 %v423_v8  ;;  %v4554_v8 = vld [vmem:[#allocation8 + $0x1e8] ss:$16 sps:$4 sm:$0xff]  }
 0x1ac   :  { %2178 = vmatpush1.bf16.msra.mxu0 %v4461_v6  ;;  %2260 = vmatpush1.bf16.msra.mxu1 %v4464_v7  ;;  %v4556_v6 = vld [vmem:[#allocation8 + $0x1ec] ss:$16 sps:$4 sm:$0xff]   ;;  %v4551_v7 = vld [vmem:[#allocation8 + $0x1e0] ss:$16 sps:$4 sm:$0xff]  }
 0x1ad   :  { %2179 = vmatprep.subr.bf16.mxu0 %v4469_v63  ;;  %2261 = vmatprep.subr.bf16.mxu1 %v4472_v9  ;;  %v4559_v63 = vld [vmem:[#allocation8 + $0x204] ss:$16 sps:$4 sm:$0xff]   ;;  %v4562_v9 = vld [vmem:[#allocation8 + $0x20c] ss:$16 sps:$4 sm:$0xff]  }
 0x1b0   :  { %2180 = vmatpush1.bf16.msra.mxu0 %v4467_v10  ;;  %2262 = vmatpush1.bf16.msra.mxu1 %v4470_v11  ;;  %v5234_v10 = vld [vmem:[%s5289_s4] sm:$0xf] }
 0x1b1   :  { %2181 = vmatprep.subr.bf16.mxu0 %v4475_v12  ;;  %2263 = vmatprep.subr.bf16.mxu1 %v4478_v13  ;;  %v558_v11 = vrot.slane %v5234_v10, %v5204_v38  ;;  %v562_v12 = vrot.slane %v5234_v10, %v5212_v40  ;;  %v570_v13 = vrot.slane %v5234_v10, %v5219_v51 }
 0x1b4   :  { %2182 = vmatpush1.bf16.msra.mxu0 %v4473_v14  ;;  %2264 = vmatpush1.bf16.msra.mxu1 %v4476_v15 }
 0x1b5   :  { %2183 = vmatprep.subr.bf16.mxu0 %v4481_v16  ;;  %2265 = vmatprep.subr.bf16.mxu1 %v4484_v17 }
 0x1b8   :  { %2184 = vmatpush1.bf16.msra.mxu0 %v4479_v18  ;;  %2266 = vmatpush1.bf16.msra.mxu1 %v4482_v19 }
 0x1b9   :  { %2185 = vmatprep.subr.bf16.mxu0 %v4487_v20  ;;  %2267 = vmatprep.subr.bf16.mxu1 %v4490_v21 }
 0x1bc   :  { %2186 = vmatpush1.bf16.msra.mxu0 %v4485_v22  ;;  %2268 = vmatpush1.bf16.msra.mxu1 %v4488_v23 }
 0x1bd   :  { %2187 = vmatprep.subr.bf16.mxu0 %v4493_v24  ;;  %2269 = vmatprep.subr.bf16.mxu1 %v4496_v25 }
 0x1c0   :  { %2188 = vmatpush1.bf16.msra.mxu0 %v4491_v26  ;;  %2270 = vmatpush1.bf16.msra.mxu1 %v4494_v27 }
 0x1c1   :  { %2189 = vmatprep.subr.bf16.mxu0 %v4499_v28  ;;  %2271 = vmatprep.subr.bf16.mxu1 %v4502_v29  ;;  %v4557_v29 = vld [vmem:[#allocation8 + $0x200] ss:$16 sps:$4 sm:$0xff]  }
 0x1c4   :  { %2190 = vmatpush1.bf16.msra.mxu0 %v4497_v30  ;;  %2272 = vmatpush1.bf16.msra.mxu1 %v4500_v31  ;;  %v4560_v30 = vld [vmem:[#allocation8 + $0x208] ss:$16 sps:$4 sm:$0xff]  }
 0x1c5   :  { %2191 = vmatprep.subr.bf16.mxu0 %v4505_v32  ;;  %2273 = vmatprep.subr.bf16.mxu1 %v4508_v33  ;;  %v4565_v32 = vld [vmem:[#allocation8 + $0x224] ss:$16 sps:$4 sm:$0xff]   ;;  %v4568_v33 = vld [vmem:[#allocation8 + $0x22c] ss:$16 sps:$4 sm:$0xff]  }
 0x1c8   :  { %2192 = vmatpush1.bf16.msra.mxu0 %v4503_v34  ;;  %2274 = vmatpush1.bf16.msra.mxu1 %v4506_v35  ;;  %v4563_v35 = vld [vmem:[#allocation8 + $0x220] ss:$16 sps:$4 sm:$0xff]  }
 0x1c9   :  { %2193 = vmatprep.subr.bf16.mxu0 %v4511_v36  ;;  %2275 = vmatprep.subr.bf16.mxu1 %v4514_v41  ;;  %v4566_v36 = vld [vmem:[#allocation8 + $0x228] ss:$16 sps:$4 sm:$0xff]   ;;  %v4571_v41 = vld [vmem:[#allocation8 + $0x244] ss:$16 sps:$4 sm:$0xff]  }
 0x1cc   :  { %2194 = vmatpush1.bf16.msra.mxu0 %v4509_v42  ;;  %2276 = vmatpush1.bf16.msra.mxu1 %v4512_v43  ;;  %v4574_v42 = vld [vmem:[#allocation8 + $0x24c] ss:$16 sps:$4 sm:$0xff]   ;;  %v4569_v43 = vld [vmem:[#allocation8 + $0x240] ss:$16 sps:$4 sm:$0xff]  }
 0x1cd   :  { %2195 = vmatprep.subr.bf16.mxu0 %v4517_v44  ;;  %2277 = vmatprep.subr.bf16.mxu1 %v4520_v45  ;;  %v4572_v44 = vld [vmem:[#allocation8 + $0x248] ss:$16 sps:$4 sm:$0xff]   ;;  %v4577_v45 = vld [vmem:[#allocation8 + $0x264] ss:$16 sps:$4 sm:$0xff]  }
 0x1d0   :  { %2196 = vmatpush1.bf16.msra.mxu0 %v4515_v46  ;;  %2278 = vmatpush1.bf16.msra.mxu1 %v4518_v47  ;;  %v4580_v46 = vld [vmem:[#allocation8 + $0x26c] ss:$16 sps:$4 sm:$0xff]   ;;  %v4575_v47 = vld [vmem:[#allocation8 + $0x260] ss:$16 sps:$4 sm:$0xff]  }
 0x1d1   :  { %2197 = vmatprep.subr.bf16.mxu0 %v4523_v48  ;;  %2279 = vmatprep.subr.bf16.mxu1 %v4526_v49  ;;  %v4578_v48 = vld [vmem:[#allocation8 + $0x268] ss:$16 sps:$4 sm:$0xff]   ;;  %v4583_v49 = vld [vmem:[#allocation8 + $0x284] ss:$16 sps:$4 sm:$0xff]  }
 0x1d4   :  { %2198 = vmatpush1.bf16.msra.mxu0 %v4521_v50  ;;  %2280 = vmatpush1.bf16.msra.mxu1 %v4524_v52  ;;  %v4586_v50 = vld [vmem:[#allocation8 + $0x28c] ss:$16 sps:$4 sm:$0xff]   ;;  %v4581_v52 = vld [vmem:[#allocation8 + $0x280] ss:$16 sps:$4 sm:$0xff]  }
 0x1d5   :  { %2199 = vmatprep.subr.bf16.mxu0 %v4529_v54  ;;  %2281 = vmatprep.subr.bf16.mxu1 %v4532_v55  ;;  %v4584_v54 = vld [vmem:[#allocation8 + $0x288] ss:$16 sps:$4 sm:$0xff]   ;;  %v4589_v55 = vld [vmem:[#allocation8 + $0x2a4] ss:$16 sps:$4 sm:$0xff]  }
 0x1d8   :  { %2200 = vmatpush1.bf16.msra.mxu0 %v4527_v56  ;;  %2282 = vmatpush1.bf16.msra.mxu1 %v4530_v57  ;;  %v4592_v56 = vld [vmem:[#allocation8 + $0x2ac] ss:$16 sps:$4 sm:$0xff]   ;;  %v4587_v57 = vld [vmem:[#allocation8 + $0x2a0] ss:$16 sps:$4 sm:$0xff]  }
 0x1d9   :  { %2201 = vmatprep.subr.bf16.mxu0 %v4535_v58  ;;  %2283 = vmatprep.subr.bf16.mxu1 %v4538_v59  ;;  %v4590_v58 = vld [vmem:[#allocation8 + $0x2a8] ss:$16 sps:$4 sm:$0xff]   ;;  %v4595_v59 = vld [vmem:[#allocation8 + $0x2c4] ss:$16 sps:$4 sm:$0xff]  }
 0x1dc   :  { %2202 = vmatpush1.bf16.msra.mxu0 %v4533_v60  ;;  %2284 = vmatpush1.bf16.msra.mxu1 %v4536_v61  ;;  %v4598_v60 = vld [vmem:[#allocation8 + $0x2cc] ss:$16 sps:$4 sm:$0xff]   ;;  %v4593_v61 = vld [vmem:[#allocation8 + $0x2c0] ss:$16 sps:$4 sm:$0xff]  }
 0x1dd   :  { %2203 = vmatprep.subr.bf16.mxu0 %v4541_v62  ;;  %2285 = vmatprep.subr.bf16.mxu1 %v4544_v37  ;;  %v4596_v62 = vld [vmem:[#allocation8 + $0x2c8] ss:$16 sps:$4 sm:$0xff]   ;;  %v4601_v37 = vld [vmem:[#allocation8 + $0x2e4] ss:$16 sps:$4 sm:$0xff]  }
 0x1e0   :  { %2204 = vmatpush1.bf16.msra.mxu0 %v4539_v0  ;;  %2286 = vmatpush1.bf16.msra.mxu1 %v4542_v1  ;;  %v4604_v0 = vld [vmem:[#allocation8 + $0x2ec] ss:$16 sps:$4 sm:$0xff]   ;;  %v4599_v1 = vld [vmem:[#allocation8 + $0x2e0] ss:$16 sps:$4 sm:$0xff]  }
 0x1e1   :  { %2205 = vmatprep.subr.bf16.mxu0 %v4547_v2  ;;  %2287 = vmatprep.subr.bf16.mxu1 %v4550_v3  ;;  %v4602_v2 = vld [vmem:[#allocation8 + $0x2e8] ss:$16 sps:$4 sm:$0xff]   ;;  %v4607_v3 = vld [vmem:[#allocation8 + $0x304] ss:$16 sps:$4 sm:$0xff]  }
 0x1e4   :  { %2206 = vmatpush1.bf16.msra.mxu0 %v4545_v4  ;;  %2288 = vmatpush1.bf16.msra.mxu1 %v4548_v39  ;;  %v4610_v4 = vld [vmem:[#allocation8 + $0x30c] ss:$16 sps:$4 sm:$0xff]   ;;  %v4605_v39 = vld [vmem:[#allocation8 + $0x300] ss:$16 sps:$4 sm:$0xff]  }
 0x1e5   :  { %2207 = vmatprep.subr.bf16.mxu0 %v4553_v5  ;;  %2289 = vmatprep.subr.bf16.mxu1 %v4556_v6  ;;  %v4608_v5 = vld [vmem:[#allocation8 + $0x308] ss:$16 sps:$4 sm:$0xff]   ;;  %v4613_v6 = vld [vmem:[#allocation8 + $0x324] ss:$16 sps:$4 sm:$0xff]  }
 0x1e8   :  { %2208 = vmatpush1.bf16.msra.mxu0 %v4551_v7  ;;  %2290 = vmatpush1.bf16.msra.mxu1 %v4554_v8  ;;  %v4616_v7 = vld [vmem:[#allocation8 + $0x32c] ss:$16 sps:$4 sm:$0xff]   ;;  %v4611_v8 = vld [vmem:[#allocation8 + $0x320] ss:$16 sps:$4 sm:$0xff]  }
 0x1e9   :  { %2218 = vmatprep.subr.bf16.mxu0 %v4559_v63  ;;  %2300 = vmatprep.subr.bf16.mxu1 %v4562_v9  ;;  %v4614_v63 = vld [vmem:[#allocation8 + $0x328] ss:$16 sps:$4 sm:$0xff]   ;;  %v4619_v9 = vld [vmem:[#allocation8 + $0x344] ss:$16 sps:$4 sm:$0xff]  }
 0x27e   :  { %v1290_v14 = vpop.f32.mrb[4].mxu0  ;;  %v5242_v15 = vpop.f32.mrb[4].mxu1 }
 0x27f   :  { %v4173_v16 = vadd.f32 %v1290_v14, %v558_v11  ;;  %v1292_v17 = vpop.f32.mrb[5].mxu0  ;;  %v1374_v18 = vpop.f32.mrb[5].mxu1  ;;  %v4622_v11 = vld [vmem:[#allocation8 + $0x34c] ss:$16 sps:$4 sm:$0xff]   ;;  %v4625_v14 = vld [vmem:[#allocation8 + $0x364] ss:$16 sps:$4 sm:$0xff]  }
 0x280   :  { %v4174_v19 = vadd.f32 %v1292_v17, %v562_v12  ;;  %v4176_v20 = vadd.f32 %v1374_v18, %v570_v13  ;;  %v1294_v21 = vpop.f32.mrb[6].mxu0  ;;  %v1376_v22 = vpop.f32.mrb[6].mxu1  ;;  %v4617_v12 = vld [vmem:[#allocation8 + $0x340] ss:$16 sps:$4 sm:$0xff]   ;;  %v4620_v13 = vld [vmem:[#allocation8 + $0x348] ss:$16 sps:$4 sm:$0xff]  }
 0x281   :  { %v1379_v23 = vmax.f32 %v4173_v16, 0.0  ;;  %v1295_v24 = vpop.f32.mrb[7].mxu0  ;;  %v1377_v25 = vpop.f32.mrb[7].mxu1  ;;  %v4628_v16 = vld [vmem:[#allocation8 + $0x36c] ss:$16 sps:$4 sm:$0xff]  }
 0x282   :  { %v1380_v26 = vmax.f32 %v4174_v19, 0.0  ;;  %v1382_v27 = vmax.f32 %v4176_v20, 0.0  ;;  %v4623_v17 = vld [vmem:[#allocation8 + $0x360] ss:$16 sps:$4 sm:$0xff]   ;;  %v4626_v18 = vld [vmem:[#allocation8 + $0x368] ss:$16 sps:$4 sm:$0xff]  }
 0x283   :  { %v1383_v31 = vpack.c.bf16 %v1379_v23, %v1379_v23  ;;  %v4631_v19 = vld [vmem:[#allocation8 + $0x384] ss:$16 sps:$4 sm:$0xff]   ;;  %v4634_v20 = vld [vmem:[#allocation8 + $0x38c] ss:$16 sps:$4 sm:$0xff]   ;;  %v4629_v21 = vld [vmem:[#allocation8 + $0x380] ss:$16 sps:$4 sm:$0xff]  }
 0x284   :  { %v1384_v28 = vpack.c.bf16 %v1380_v26, %v1380_v26  ;;  %v1386_v34 = vpack.c.bf16 %v1382_v27, %v1382_v27  ;;  %v4632_v22 = vld [vmem:[#allocation8 + $0x388] ss:$16 sps:$4 sm:$0xff]   ;;  %v4637_v23 = vld [vmem:[#allocation8 + $0x3a4] ss:$16 sps:$4 sm:$0xff]   ;;  %v4640_v24 = vld [vmem:[#allocation8 + $0x3ac] ss:$16 sps:$4 sm:$0xff]   ;;  %v566_v27 = vrot.slane %v5234_v10, %v5226_v53 }
 0x285   :  { %v4635_v25 = vld [vmem:[#allocation8 + $0x3a0] ss:$16 sps:$4 sm:$0xff]   ;;  %v4638_v26 = vld [vmem:[#allocation8 + $0x3a8] ss:$16 sps:$4 sm:$0xff]   ;;  %v4655_v10 = vld [vmem:[#allocation10 + $0x4] ss:$16 sps:$4 sm:$0xff]  }
 0x286   :  { %2209 = vmatprep.mubr.bf16.mxu0 %v1384_v28  ;;  %2291 = vmatprep.mubr.bf16.mxu1 %v1384_v28  ;;  %v4643_v28 = vld [vmem:[#allocation8 + $0x3c4] ss:$16 sps:$4 sm:$0xff]  }
 0x287   :  { %2210 = vmatmul.mubr.bf16.vlgmr.msra.gmra.mrb[8].mxu0 %v1383_v31  ;;  %2292 = vmatmul.mubr.bf16.vlgmr.msra.gmra.mrb[8].mxu1 %v1383_v31  ;;  %v4644_v31 = vld [vmem:[#allocation8 + $0x3c8] ss:$16 sps:$4 sm:$0xff]  }
 0x288   :  { %2219 = vmatpush1.bf16.msra.mxu0 %v4557_v29  ;;  %2301 = vmatpush1.bf16.msra.mxu1 %v4560_v30  ;;  %v4646_v29 = vld [vmem:[#allocation8 + $0x3cc] ss:$16 sps:$4 sm:$0xff]   ;;  %v4641_v30 = vld [vmem:[#allocation8 + $0x3c0] ss:$16 sps:$4 sm:$0xff]  }
 0x289   :  { %2250 = vmatprep.mubr.bf16.mxu0 %v1386_v34  ;;  %2332 = vmatprep.mubr.bf16.mxu1 %v1386_v34  ;;  %v4652_v34 = vld [vmem:[#allocation8 + $0x3ec] ss:$16 sps:$4 sm:$0xff]  }
 0x28a   :  { %2220 = vmatprep.subr.bf16.mxu0 %v4565_v32  ;;  %2302 = vmatprep.subr.bf16.mxu1 %v4568_v33  ;;  %v4175_v32 = vadd.f32 %v5242_v15, %v566_v27  ;;  %v4649_v33 = vld [vmem:[#allocation8 + $0x3e4] ss:$16 sps:$4 sm:$0xff]  }
 0x28b   :  { %v4661_v15 = vld [vmem:[#allocation10 + $0x24] ss:$16 sps:$4 sm:$0xff]  }
 0x28c   :  { %2221 = vmatpush1.bf16.msra.mxu0 %v4563_v35  ;;  %2303 = vmatpush1.bf16.msra.mxu1 %v4566_v36  ;;  %v4647_v35 = vld [vmem:[#allocation8 + $0x3e0] ss:$16 sps:$4 sm:$0xff]   ;;  %v4650_v36 = vld [vmem:[#allocation8 + $0x3e8] ss:$16 sps:$4 sm:$0xff]   ;;  %v4727_v27 = vld [vmem:[#allocation10 + $0x184] ss:$16 sps:$4 sm:$0xff]  }
 0x28d   :  { %2222 = vmatprep.subr.bf16.mxu0 %v4571_v41  ;;  %2304 = vmatprep.subr.bf16.mxu1 %v4574_v42  ;;  %v1381_v41 = vmax.f32 %v4175_v32, 0.0  ;;  %v4658_v42 = vld [vmem:[#allocation10 + $0xc] ss:$16 sps:$4 sm:$0xff]  }
 0x28e   :  { %v4736_v32 = vld [vmem:[#allocation10 + $0x1ac] ss:$16 sps:$4 sm:$0xff]  }
 0x290   :  { %2223 = vmatpush1.bf16.msra.mxu0 %v4569_v43  ;;  %2305 = vmatpush1.bf16.msra.mxu1 %v4572_v44  ;;  %v4653_v43 = vld [vmem:[#allocation10] ss:$16 sps:$4 sm:$0xff]   ;;  %v4656_v44 = vld [vmem:[#allocation10 + $0x8] ss:$16 sps:$4 sm:$0xff]  }
 0x291   :  { %2224 = vmatprep.subr.bf16.mxu0 %v4577_v45  ;;  %2306 = vmatprep.subr.bf16.mxu1 %v4580_v46  ;;  %v1385_v45 = vpack.c.bf16 %v1381_v41, %v1381_v41  ;;  %v4664_v46 = vld [vmem:[#allocation10 + $0x2c] ss:$16 sps:$4 sm:$0xff]   ;;  %v4737_v41 = vld [vmem:[#allocation10 + $0x1c0] ss:$16 sps:$4 sm:$0xff]  }
 0x294   :  { %2225 = vmatpush1.bf16.msra.mxu0 %v4575_v47  ;;  %2307 = vmatpush1.bf16.msra.mxu1 %v4578_v48  ;;  %v4659_v47 = vld [vmem:[#allocation10 + $0x20] ss:$16 sps:$4 sm:$0xff]   ;;  %v4662_v48 = vld [vmem:[#allocation10 + $0x28] ss:$16 sps:$4 sm:$0xff]  }
 0x295   :  { %2226 = vmatprep.subr.bf16.mxu0 %v4583_v49  ;;  %2308 = vmatprep.subr.bf16.mxu1 %v4586_v50  ;;  %v4667_v49 = vld [vmem:[#allocation10 + $0x44] ss:$16 sps:$4 sm:$0xff]   ;;  %v4670_v50 = vld [vmem:[#allocation10 + $0x4c] ss:$16 sps:$4 sm:$0xff]  }
 0x298   :  { %2227 = vmatpush1.bf16.msra.mxu0 %v4581_v52  ;;  %2309 = vmatpush1.bf16.msra.mxu1 %v4584_v54  ;;  %v4665_v52 = vld [vmem:[#allocation10 + $0x40] ss:$16 sps:$4 sm:$0xff]   ;;  %v4668_v54 = vld [vmem:[#allocation10 + $0x48] ss:$16 sps:$4 sm:$0xff]  }
 0x299   :  { %2228 = vmatprep.subr.bf16.mxu0 %v4589_v55  ;;  %2310 = vmatprep.subr.bf16.mxu1 %v4592_v56  ;;  %v4673_v55 = vld [vmem:[#allocation10 + $0x64] ss:$16 sps:$4 sm:$0xff]   ;;  %v4676_v56 = vld [vmem:[#allocation10 + $0x6c] ss:$16 sps:$4 sm:$0xff]  }
 0x29c   :  { %2229 = vmatpush1.bf16.msra.mxu0 %v4587_v57  ;;  %2311 = vmatpush1.bf16.msra.mxu1 %v4590_v58  ;;  %v4671_v57 = vld [vmem:[#allocation10 + $0x60] ss:$16 sps:$4 sm:$0xff]   ;;  %v4674_v58 = vld [vmem:[#allocation10 + $0x68] ss:$16 sps:$4 sm:$0xff]  }
 0x29d   :  { %2230 = vmatprep.subr.bf16.mxu0 %v4595_v59  ;;  %2312 = vmatprep.subr.bf16.mxu1 %v4598_v60  ;;  %v4679_v59 = vld [vmem:[#allocation10 + $0x84] ss:$16 sps:$4 sm:$0xff]   ;;  %v4682_v60 = vld [vmem:[#allocation10 + $0x8c] ss:$16 sps:$4 sm:$0xff]  }
 0x2a0   :  { %2231 = vmatpush1.bf16.msra.mxu0 %v4593_v61  ;;  %2313 = vmatpush1.bf16.msra.mxu1 %v4596_v62  ;;  %v4677_v61 = vld [vmem:[#allocation10 + $0x80] ss:$16 sps:$4 sm:$0xff]   ;;  %v4680_v62 = vld [vmem:[#allocation10 + $0x88] ss:$16 sps:$4 sm:$0xff]  }
 0x2a1   :  { %2232 = vmatprep.subr.bf16.mxu0 %v4601_v37  ;;  %2314 = vmatprep.subr.bf16.mxu1 %v4604_v0  ;;  %v4685_v37 = vld [vmem:[#allocation10 + $0xa4] ss:$16 sps:$4 sm:$0xff]   ;;  %v4688_v0 = vld [vmem:[#allocation10 + $0xac] ss:$16 sps:$4 sm:$0xff]  }
 0x2a4   :  { %2233 = vmatpush1.bf16.msra.mxu0 %v4599_v1  ;;  %2315 = vmatpush1.bf16.msra.mxu1 %v4602_v2  ;;  %v4683_v1 = vld [vmem:[#allocation10 + $0xa0] ss:$16 sps:$4 sm:$0xff]   ;;  %v4686_v2 = vld [vmem:[#allocation10 + $0xa8] ss:$16 sps:$4 sm:$0xff]  }
 0x2a5   :  { %2234 = vmatprep.subr.bf16.mxu0 %v4607_v3  ;;  %2316 = vmatprep.subr.bf16.mxu1 %v4610_v4  ;;  %v4691_v3 = vld [vmem:[#allocation10 + $0xc4] ss:$16 sps:$4 sm:$0xff]   ;;  %v4694_v4 = vld [vmem:[#allocation10 + $0xcc] ss:$16 sps:$4 sm:$0xff]  }
 0x2a8   :  { %2235 = vmatpush1.bf16.msra.mxu0 %v4605_v39  ;;  %2317 = vmatpush1.bf16.msra.mxu1 %v4608_v5  ;;  %v4689_v39 = vld [vmem:[#allocation10 + $0xc0] ss:$16 sps:$4 sm:$0xff]   ;;  %v4692_v5 = vld [vmem:[#allocation10 + $0xc8] ss:$16 sps:$4 sm:$0xff]  }
 0x2a9   :  { %2236 = vmatprep.subr.bf16.mxu0 %v4613_v6  ;;  %2318 = vmatprep.subr.bf16.mxu1 %v4616_v7  ;;  %v4697_v6 = vld [vmem:[#allocation10 + $0xe4] ss:$16 sps:$4 sm:$0xff]   ;;  %v4700_v7 = vld [vmem:[#allocation10 + $0xec] ss:$16 sps:$4 sm:$0xff]  }
 0x2ac   :  { %2237 = vmatpush1.bf16.msra.mxu0 %v4611_v8  ;;  %2319 = vmatpush1.bf16.msra.mxu1 %v4614_v63  ;;  %v4695_v8 = vld [vmem:[#allocation10 + $0xe0] ss:$16 sps:$4 sm:$0xff]   ;;  %v4698_v63 = vld [vmem:[#allocation10 + $0xe8] ss:$16 sps:$4 sm:$0xff]  }
 0x2ad   :  { %2238 = vmatprep.subr.bf16.mxu0 %v4619_v9  ;;  %2320 = vmatprep.subr.bf16.mxu1 %v4622_v11  ;;  %v4703_v9 = vld [vmem:[#allocation10 + $0x104] ss:$16 sps:$4 sm:$0xff]   ;;  %v4706_v11 = vld [vmem:[#allocation10 + $0x10c] ss:$16 sps:$4 sm:$0xff]  }
 0x2b0   :  { %2239 = vmatpush1.bf16.msra.mxu0 %v4617_v12  ;;  %2321 = vmatpush1.bf16.msra.mxu1 %v4620_v13  ;;  %v4701_v12 = vld [vmem:[#allocation10 + $0x100] ss:$16 sps:$4 sm:$0xff]   ;;  %v4704_v13 = vld [vmem:[#allocation10 + $0x108] ss:$16 sps:$4 sm:$0xff]  }
 0x2b1   :  { %2240 = vmatprep.subr.bf16.mxu0 %v4625_v14  ;;  %2322 = vmatprep.subr.bf16.mxu1 %v4628_v16  ;;  %v4709_v14 = vld [vmem:[#allocation10 + $0x124] ss:$16 sps:$4 sm:$0xff]   ;;  %v4712_v16 = vld [vmem:[#allocation10 + $0x12c] ss:$16 sps:$4 sm:$0xff]  }
 0x2b4   :  { %2241 = vmatpush1.bf16.msra.mxu0 %v4623_v17  ;;  %2323 = vmatpush1.bf16.msra.mxu1 %v4626_v18  ;;  %v4707_v17 = vld [vmem:[#allocation10 + $0x120] ss:$16 sps:$4 sm:$0xff]   ;;  %v4710_v18 = vld [vmem:[#allocation10 + $0x128] ss:$16 sps:$4 sm:$0xff]  }
 0x2b5   :  { %2242 = vmatprep.subr.bf16.mxu0 %v4631_v19  ;;  %2324 = vmatprep.subr.bf16.mxu1 %v4634_v20  ;;  %v4715_v19 = vld [vmem:[#allocation10 + $0x144] ss:$16 sps:$4 sm:$0xff]   ;;  %v4718_v20 = vld [vmem:[#allocation10 + $0x14c] ss:$16 sps:$4 sm:$0xff]  }
 0x2b8   :  { %2243 = vmatpush1.bf16.msra.mxu0 %v4629_v21  ;;  %2325 = vmatpush1.bf16.msra.mxu1 %v4632_v22  ;;  %v4713_v21 = vld [vmem:[#allocation10 + $0x140] ss:$16 sps:$4 sm:$0xff]   ;;  %v4716_v22 = vld [vmem:[#allocation10 + $0x148] ss:$16 sps:$4 sm:$0xff]  }
 0x2b9   :  { %2244 = vmatprep.subr.bf16.mxu0 %v4637_v23  ;;  %2326 = vmatprep.subr.bf16.mxu1 %v4640_v24  ;;  %v4721_v23 = vld [vmem:[#allocation10 + $0x164] ss:$16 sps:$4 sm:$0xff]   ;;  %v4724_v24 = vld [vmem:[#allocation10 + $0x16c] ss:$16 sps:$4 sm:$0xff]  }
 0x2bc   :  { %2245 = vmatpush1.bf16.msra.mxu0 %v4635_v25  ;;  %2327 = vmatpush1.bf16.msra.mxu1 %v4638_v26  ;;  %v4719_v25 = vld [vmem:[#allocation10 + $0x160] ss:$16 sps:$4 sm:$0xff]   ;;  %v4722_v26 = vld [vmem:[#allocation10 + $0x168] ss:$16 sps:$4 sm:$0xff]  }
 0x2bd   :  { %2246 = vmatprep.subr.bf16.mxu0 %v4643_v28  ;;  %2328 = vmatprep.subr.bf16.mxu1 %v4646_v29  ;;  %v4730_v28 = vld [vmem:[#allocation10 + $0x18c] ss:$16 sps:$4 sm:$0xff]   ;;  %v4725_v29 = vld [vmem:[#allocation10 + $0x180] ss:$16 sps:$4 sm:$0xff]  }
 0x2c0   :  { %2247 = vmatpush1.bf16.msra.mxu0 %v4641_v30  ;;  %2329 = vmatpush1.bf16.msra.mxu1 %v4644_v31  ;;  %v4728_v30 = vld [vmem:[#allocation10 + $0x188] ss:$16 sps:$4 sm:$0xff]   ;;  %v4733_v31 = vld [vmem:[#allocation10 + $0x1a4] ss:$16 sps:$4 sm:$0xff]  }
 0x2c1   :  { %2248 = vmatprep.subr.bf16.mxu0 %v4649_v33  ;;  %2330 = vmatprep.subr.bf16.mxu1 %v4652_v34  ;;  %v4731_v33 = vld [vmem:[#allocation10 + $0x1a0] ss:$16 sps:$4 sm:$0xff]   ;;  %v4734_v34 = vld [vmem:[#allocation10 + $0x1a8] ss:$16 sps:$4 sm:$0xff]  }
 0x2c4   :  { %2249 = vmatpush1.bf16.msra.mxu0 %v4647_v35  ;;  %2331 = vmatpush1.bf16.msra.mxu1 %v4650_v36  ;;  %v4739_v35 = vld [vmem:[#allocation10 + $0x1c4] ss:$16 sps:$4 sm:$0xff]   ;;  %v4742_v36 = vld [vmem:[#allocation10 + $0x1cc] ss:$16 sps:$4 sm:$0xff]  }
 0x2c5   :  { %3139 = vmatprep.subr.bf16.mxu0 %v4655_v10  ;;  %3221 = vmatprep.subr.bf16.mxu1 %v4658_v42  ;;  %v4740_v10 = vld [vmem:[#allocation10 + $0x1c8] ss:$16 sps:$4 sm:$0xff]   ;;  %v4745_v42 = vld [vmem:[#allocation10 + $0x1e4] ss:$16 sps:$4 sm:$0xff]  }
 0x2c7   :  { %2251 = vmatmul.mubr.bf16.vlgmr.msra.gmra.mrb[8].mxu0 %v1385_v45  ;;  %2333 = vmatmul.mubr.bf16.vlgmr.msra.gmra.mrb[8].mxu1 %v1385_v45  ;;  %v4746_v45 = vld [vmem:[#allocation10 + $0x1e8] ss:$16 sps:$4 sm:$0xff]  }
 0x2c8   :  { %3140 = vmatpush1.bf16.msra.mxu0 %v4653_v43  ;;  %3222 = vmatpush1.bf16.msra.mxu1 %v4656_v44  ;;  %v4748_v43 = vld [vmem:[#allocation10 + $0x1ec] ss:$16 sps:$4 sm:$0xff]   ;;  %v4743_v44 = vld [vmem:[#allocation10 + $0x1e0] ss:$16 sps:$4 sm:$0xff]  }
 0x2c9   :  { %3141 = vmatprep.subr.bf16.mxu0 %v4661_v15  ;;  %3223 = vmatprep.subr.bf16.mxu1 %v4664_v46  ;;  %v4751_v15 = vld [vmem:[#allocation10 + $0x204] ss:$16 sps:$4 sm:$0xff]   ;;  %v4754_v46 = vld [vmem:[#allocation10 + $0x20c] ss:$16 sps:$4 sm:$0xff]  }
 0x2cc   :  { %3142 = vmatpush1.bf16.msra.mxu0 %v4659_v47  ;;  %3224 = vmatpush1.bf16.msra.mxu1 %v4662_v48  ;;  %v5250_v47 = vld [vmem:[%s5291_s6] sm:$0xf] }
 0x2cd   :  { %3143 = vmatprep.subr.bf16.mxu0 %v4667_v49  ;;  %3225 = vmatprep.subr.bf16.mxu1 %v4670_v50  ;;  %v1520_v48 = vrot.slane %v5250_v47, %v5204_v38  ;;  %v1524_v49 = vrot.slane %v5250_v47, %v5212_v40  ;;  %v1532_v50 = vrot.slane %v5250_v47, %v5219_v51 }
 0x2d0   :  { %3144 = vmatpush1.bf16.msra.mxu0 %v4665_v52  ;;  %3226 = vmatpush1.bf16.msra.mxu1 %v4668_v54 }
 0x2d1   :  { %3145 = vmatprep.subr.bf16.mxu0 %v4673_v55  ;;  %3227 = vmatprep.subr.bf16.mxu1 %v4676_v56 }
 0x2d4   :  { %3146 = vmatpush1.bf16.msra.mxu0 %v4671_v57  ;;  %3228 = vmatpush1.bf16.msra.mxu1 %v4674_v58 }
 0x2d5   :  { %3147 = vmatprep.subr.bf16.mxu0 %v4679_v59  ;;  %3229 = vmatprep.subr.bf16.mxu1 %v4682_v60 }
 0x2d8   :  { %3148 = vmatpush1.bf16.msra.mxu0 %v4677_v61  ;;  %3230 = vmatpush1.bf16.msra.mxu1 %v4680_v62 }
 0x2d9   :  { %3149 = vmatprep.subr.bf16.mxu0 %v4685_v37  ;;  %3231 = vmatprep.subr.bf16.mxu1 %v4688_v0 }
 0x2dc   :  { %3150 = vmatpush1.bf16.msra.mxu0 %v4683_v1  ;;  %3232 = vmatpush1.bf16.msra.mxu1 %v4686_v2 }
 0x2dd   :  { %3151 = vmatprep.subr.bf16.mxu0 %v4691_v3  ;;  %3233 = vmatprep.subr.bf16.mxu1 %v4694_v4  ;;  %v4749_v4 = vld [vmem:[#allocation10 + $0x200] ss:$16 sps:$4 sm:$0xff]  }
 0x2e0   :  { %3152 = vmatpush1.bf16.msra.mxu0 %v4689_v39  ;;  %3234 = vmatpush1.bf16.msra.mxu1 %v4692_v5  ;;  %v4752_v39 = vld [vmem:[#allocation10 + $0x208] ss:$16 sps:$4 sm:$0xff]  }
 0x2e1   :  { %3153 = vmatprep.subr.bf16.mxu0 %v4697_v6  ;;  %3235 = vmatprep.subr.bf16.mxu1 %v4700_v7  ;;  %v4757_v6 = vld [vmem:[#allocation10 + $0x224] ss:$16 sps:$4 sm:$0xff]   ;;  %v4760_v7 = vld [vmem:[#allocation10 + $0x22c] ss:$16 sps:$4 sm:$0xff]  }
 0x2e4   :  { %3154 = vmatpush1.bf16.msra.mxu0 %v4695_v8  ;;  %3236 = vmatpush1.bf16.msra.mxu1 %v4698_v63  ;;  %v4755_v63 = vld [vmem:[#allocation10 + $0x220] ss:$16 sps:$4 sm:$0xff]  }
 0x2e5   :  { %3155 = vmatprep.subr.bf16.mxu0 %v4703_v9  ;;  %3237 = vmatprep.subr.bf16.mxu1 %v4706_v11  ;;  %v4758_v9 = vld [vmem:[#allocation10 + $0x228] ss:$16 sps:$4 sm:$0xff]   ;;  %v4763_v11 = vld [vmem:[#allocation10 + $0x244] ss:$16 sps:$4 sm:$0xff]  }
 0x2e8   :  { %3156 = vmatpush1.bf16.msra.mxu0 %v4701_v12  ;;  %3238 = vmatpush1.bf16.msra.mxu1 %v4704_v13  ;;  %v4766_v12 = vld [vmem:[#allocation10 + $0x24c] ss:$16 sps:$4 sm:$0xff]   ;;  %v4761_v13 = vld [vmem:[#allocation10 + $0x240] ss:$16 sps:$4 sm:$0xff]  }
 0x2e9   :  { %3157 = vmatprep.subr.bf16.mxu0 %v4709_v14  ;;  %3239 = vmatprep.subr.bf16.mxu1 %v4712_v16  ;;  %v4764_v14 = vld [vmem:[#allocation10 + $0x248] ss:$16 sps:$4 sm:$0xff]   ;;  %v4769_v16 = vld [vmem:[#allocation10 + $0x264] ss:$16 sps:$4 sm:$0xff]  }
 0x2ec   :  { %3158 = vmatpush1.bf16.msra.mxu0 %v4707_v17  ;;  %3240 = vmatpush1.bf16.msra.mxu1 %v4710_v18  ;;  %v4772_v17 = vld [vmem:[#allocation10 + $0x26c] ss:$16 sps:$4 sm:$0xff]   ;;  %v4767_v18 = vld [vmem:[#allocation10 + $0x260] ss:$16 sps:$4 sm:$0xff]  }
 0x2ed   :  { %3159 = vmatprep.subr.bf16.mxu0 %v4715_v19  ;;  %3241 = vmatprep.subr.bf16.mxu1 %v4718_v20  ;;  %v4770_v19 = vld [vmem:[#allocation10 + $0x268] ss:$16 sps:$4 sm:$0xff]   ;;  %v4775_v20 = vld [vmem:[#allocation10 + $0x284] ss:$16 sps:$4 sm:$0xff]  }
 0x2f0   :  { %3160 = vmatpush1.bf16.msra.mxu0 %v4713_v21  ;;  %3242 = vmatpush1.bf16.msra.mxu1 %v4716_v22  ;;  %v4778_v21 = vld [vmem:[#allocation10 + $0x28c] ss:$16 sps:$4 sm:$0xff]   ;;  %v4773_v22 = vld [vmem:[#allocation10 + $0x280] ss:$16 sps:$4 sm:$0xff]  }
 0x2f1   :  { %3161 = vmatprep.subr.bf16.mxu0 %v4721_v23  ;;  %3243 = vmatprep.subr.bf16.mxu1 %v4724_v24  ;;  %v4776_v23 = vld [vmem:[#allocation10 + $0x288] ss:$16 sps:$4 sm:$0xff]   ;;  %v4781_v24 = vld [vmem:[#allocation10 + $0x2a4] ss:$16 sps:$4 sm:$0xff]  }
 0x2f4   :  { %3162 = vmatpush1.bf16.msra.mxu0 %v4719_v25  ;;  %3244 = vmatpush1.bf16.msra.mxu1 %v4722_v26  ;;  %v4784_v25 = vld [vmem:[#allocation10 + $0x2ac] ss:$16 sps:$4 sm:$0xff]   ;;  %v4779_v26 = vld [vmem:[#allocation10 + $0x2a0] ss:$16 sps:$4 sm:$0xff]  }
 0x2f5   :  { %3163 = vmatprep.subr.bf16.mxu0 %v4727_v27  ;;  %3245 = vmatprep.subr.bf16.mxu1 %v4730_v28  ;;  %v4782_v27 = vld [vmem:[#allocation10 + $0x2a8] ss:$16 sps:$4 sm:$0xff]   ;;  %v4787_v28 = vld [vmem:[#allocation10 + $0x2c4] ss:$16 sps:$4 sm:$0xff]  }
 0x2f8   :  { %3164 = vmatpush1.bf16.msra.mxu0 %v4725_v29  ;;  %3246 = vmatpush1.bf16.msra.mxu1 %v4728_v30  ;;  %v4790_v29 = vld [vmem:[#allocation10 + $0x2cc] ss:$16 sps:$4 sm:$0xff]   ;;  %v4785_v30 = vld [vmem:[#allocation10 + $0x2c0] ss:$16 sps:$4 sm:$0xff]  }
 0x2f9   :  { %3165 = vmatprep.subr.bf16.mxu0 %v4733_v31  ;;  %3247 = vmatprep.subr.bf16.mxu1 %v4736_v32  ;;  %v4788_v31 = vld [vmem:[#allocation10 + $0x2c8] ss:$16 sps:$4 sm:$0xff]   ;;  %v4793_v32 = vld [vmem:[#allocation10 + $0x2e4] ss:$16 sps:$4 sm:$0xff]  }
 0x2fc   :  { %3166 = vmatpush1.bf16.msra.mxu0 %v4731_v33  ;;  %3248 = vmatpush1.bf16.msra.mxu1 %v4734_v34  ;;  %v4796_v33 = vld [vmem:[#allocation10 + $0x2ec] ss:$16 sps:$4 sm:$0xff]   ;;  %v4791_v34 = vld [vmem:[#allocation10 + $0x2e0] ss:$16 sps:$4 sm:$0xff]  }
 0x2fd   :  { %3167 = vmatprep.subr.bf16.mxu0 %v4739_v35  ;;  %3249 = vmatprep.subr.bf16.mxu1 %v4742_v36  ;;  %v4794_v35 = vld [vmem:[#allocation10 + $0x2e8] ss:$16 sps:$4 sm:$0xff]   ;;  %v4799_v36 = vld [vmem:[#allocation10 + $0x304] ss:$16 sps:$4 sm:$0xff]  }
 0x300   :  { %3168 = vmatpush1.bf16.msra.mxu0 %v4737_v41  ;;  %3250 = vmatpush1.bf16.msra.mxu1 %v4740_v10  ;;  %v4802_v41 = vld [vmem:[#allocation10 + $0x30c] ss:$16 sps:$4 sm:$0xff]   ;;  %v4797_v10 = vld [vmem:[#allocation10 + $0x300] ss:$16 sps:$4 sm:$0xff]  }
 0x301   :  { %3169 = vmatprep.subr.bf16.mxu0 %v4745_v42  ;;  %3251 = vmatprep.subr.bf16.mxu1 %v4748_v43  ;;  %v4800_v42 = vld [vmem:[#allocation10 + $0x308] ss:$16 sps:$4 sm:$0xff]   ;;  %v4805_v43 = vld [vmem:[#allocation10 + $0x324] ss:$16 sps:$4 sm:$0xff]  }
 0x304   :  { %3170 = vmatpush1.bf16.msra.mxu0 %v4743_v44  ;;  %3252 = vmatpush1.bf16.msra.mxu1 %v4746_v45  ;;  %v4808_v44 = vld [vmem:[#allocation10 + $0x32c] ss:$16 sps:$4 sm:$0xff]   ;;  %v4803_v45 = vld [vmem:[#allocation10 + $0x320] ss:$16 sps:$4 sm:$0xff]  }
 0x305   :  { %3180 = vmatprep.subr.bf16.mxu0 %v4751_v15  ;;  %3262 = vmatprep.subr.bf16.mxu1 %v4754_v46  ;;  %v4806_v15 = vld [vmem:[#allocation10 + $0x328] ss:$16 sps:$4 sm:$0xff]   ;;  %v4811_v46 = vld [vmem:[#allocation10 + $0x344] ss:$16 sps:$4 sm:$0xff]  }
 0x39a   :  { %v2252_v52 = vpop.f32.mrb[8].mxu0  ;;  %v5258_v54 = vpop.f32.mrb[8].mxu1 }
 0x39b   :  { %v4177_v55 = vadd.f32 %v2252_v52, %v1520_v48  ;;  %v2254_v56 = vpop.f32.mrb[9].mxu0  ;;  %v2336_v57 = vpop.f32.mrb[9].mxu1  ;;  %v4814_v48 = vld [vmem:[#allocation10 + $0x34c] ss:$16 sps:$4 sm:$0xff]   ;;  %v4817_v52 = vld [vmem:[#allocation10 + $0x364] ss:$16 sps:$4 sm:$0xff]  }
 0x39c   :  { %v4178_v58 = vadd.f32 %v2254_v56, %v1524_v49  ;;  %v4180_v59 = vadd.f32 %v2336_v57, %v1532_v50  ;;  %v2256_v60 = vpop.f32.mrb[10].mxu0  ;;  %v2338_v61 = vpop.f32.mrb[10].mxu1  ;;  %v4809_v49 = vld [vmem:[#allocation10 + $0x340] ss:$16 sps:$4 sm:$0xff]   ;;  %v4812_v50 = vld [vmem:[#allocation10 + $0x348] ss:$16 sps:$4 sm:$0xff]  }
 0x39d   :  { %v2341_v62 = vmax.f32 %v4177_v55, 0.0  ;;  %v2257_v37 = vpop.f32.mrb[11].mxu0  ;;  %v2339_v0 = vpop.f32.mrb[11].mxu1  ;;  %v4820_v55 = vld [vmem:[#allocation10 + $0x36c] ss:$16 sps:$4 sm:$0xff]  }
 0x39e   :  { %v2342_v1 = vmax.f32 %v4178_v58, 0.0  ;;  %v2344_v2 = vmax.f32 %v4180_v59, 0.0  ;;  %v4815_v56 = vld [vmem:[#allocation10 + $0x360] ss:$16 sps:$4 sm:$0xff]   ;;  %v4818_v57 = vld [vmem:[#allocation10 + $0x368] ss:$16 sps:$4 sm:$0xff]  }
 0x39f   :  { %v2345_v5 = vpack.c.bf16 %v2341_v62, %v2341_v62  ;;  %v4823_v58 = vld [vmem:[#allocation10 + $0x384] ss:$16 sps:$4 sm:$0xff]   ;;  %v4826_v59 = vld [vmem:[#allocation10 + $0x38c] ss:$16 sps:$4 sm:$0xff]   ;;  %v4821_v60 = vld [vmem:[#allocation10 + $0x380] ss:$16 sps:$4 sm:$0xff]  }
 0x3a0   :  { %v2346_v3 = vpack.c.bf16 %v2342_v1, %v2342_v1  ;;  %v2348_v8 = vpack.c.bf16 %v2344_v2, %v2344_v2  ;;  %v4824_v61 = vld [vmem:[#allocation10 + $0x388] ss:$16 sps:$4 sm:$0xff]   ;;  %v4829_v62 = vld [vmem:[#allocation10 + $0x3a4] ss:$16 sps:$4 sm:$0xff]   ;;  %v4832_v37 = vld [vmem:[#allocation10 + $0x3ac] ss:$16 sps:$4 sm:$0xff]   ;;  %v1528_v2 = vrot.slane %v5250_v47, %v5226_v53 }
 0x3a1   :  { %v4827_v0 = vld [vmem:[#allocation10 + $0x3a0] ss:$16 sps:$4 sm:$0xff]   ;;  %v4830_v1 = vld [vmem:[#allocation10 + $0x3a8] ss:$16 sps:$4 sm:$0xff]  }
 0x3a2   :  { %3171 = vmatprep.mubr.bf16.mxu0 %v2346_v3  ;;  %3253 = vmatprep.mubr.bf16.mxu1 %v2346_v3  ;;  %v4835_v3 = vld [vmem:[#allocation10 + $0x3c4] ss:$16 sps:$4 sm:$0xff]  }
 0x3a3   :  { %3172 = vmatmul.mubr.bf16.vlgmr.msra.gmra.mrb[12].mxu0 %v2345_v5  ;;  %3254 = vmatmul.mubr.bf16.vlgmr.msra.gmra.mrb[12].mxu1 %v2345_v5  ;;  %v4836_v5 = vld [vmem:[#allocation10 + $0x3c8] ss:$16 sps:$4 sm:$0xff]   ;;  %v4845_v47 = vld [vmem:[#allocation11 + $0x40] sm:$0xff]  }
 0x3a4   :  { %3181 = vmatpush1.bf16.msra.mxu0 %v4749_v4  ;;  %3263 = vmatpush1.bf16.msra.mxu1 %v4752_v39  ;;  %v4838_v4 = vld [vmem:[#allocation10 + $0x3cc] ss:$16 sps:$4 sm:$0xff]   ;;  %v4833_v39 = vld [vmem:[#allocation10 + $0x3c0] ss:$16 sps:$4 sm:$0xff]  }
 0x3a5   :  { %3212 = vmatprep.mubr.bf16.mxu0 %v2348_v8  ;;  %3294 = vmatprep.mubr.bf16.mxu1 %v2348_v8  ;;  %v4844_v8 = vld [vmem:[#allocation10 + $0x3ec] ss:$16 sps:$4 sm:$0xff]  }
 0x3a6   :  { %3182 = vmatprep.subr.bf16.mxu0 %v4757_v6  ;;  %3264 = vmatprep.subr.bf16.mxu1 %v4760_v7  ;;  %v4179_v6 = vadd.f32 %v5258_v54, %v1528_v2  ;;  %v4841_v7 = vld [vmem:[#allocation10 + $0x3e4] ss:$16 sps:$4 sm:$0xff]   ;;  %v4849_v54 = vld [vmem:[#allocation11 + $0x48] sm:$0xff]  }
 0x3a8   :  { %3183 = vmatpush1.bf16.msra.mxu0 %v4755_v63  ;;  %3265 = vmatpush1.bf16.msra.mxu1 %v4758_v9  ;;  %v4839_v63 = vld [vmem:[#allocation10 + $0x3e0] ss:$16 sps:$4 sm:$0xff]   ;;  %v4842_v9 = vld [vmem:[#allocation10 + $0x3e8] ss:$16 sps:$4 sm:$0xff]  }
 0x3a9   :  { %3184 = vmatprep.subr.bf16.mxu0 %v4763_v11  ;;  %3266 = vmatprep.subr.bf16.mxu1 %v4766_v12  ;;  %v2343_v11 = vmax.f32 %v4179_v6, 0.0  ;;  %v4846_v12 = vld [vmem:[#allocation11 + $0xc0] sm:$0xff]  }
 0x3ac   :  { %3185 = vmatpush1.bf16.msra.mxu0 %v4761_v13  ;;  %3267 = vmatpush1.bf16.msra.mxu1 %v4764_v14  ;;  %v4847_v13 = vld [vmem:[#allocation11] sm:$0xff]  }
 0x3ad   :  { %3186 = vmatprep.subr.bf16.mxu0 %v4769_v16  ;;  %3268 = vmatprep.subr.bf16.mxu1 %v4772_v17  ;;  %v4848_v14 = vld [vmem:[#allocation11 + $0x80] sm:$0xff]   ;;  %v2347_v16 = vpack.c.bf16 %v2343_v11, %v2343_v11  ;;  %v4850_v17 = vld [vmem:[#allocation11 + $0xc8] sm:$0xff]  }
 0x3b0   :  { %3187 = vmatpush1.bf16.msra.mxu0 %v4767_v18  ;;  %3269 = vmatpush1.bf16.msra.mxu1 %v4770_v19  ;;  %v4851_v18 = vld [vmem:[#allocation11 + $0x8] sm:$0xff]  }
 0x3b1   :  { %3188 = vmatprep.subr.bf16.mxu0 %v4775_v20  ;;  %3270 = vmatprep.subr.bf16.mxu1 %v4778_v21  ;;  %v4852_v19 = vld [vmem:[#allocation11 + $0x88] sm:$0xff]   ;;  %v4853_v20 = vld [vmem:[#allocation11 + $0x50] sm:$0xff]  }
 0x3b2   :  { %v4854_v21 = vld [vmem:[#allocation11 + $0xd0] sm:$0xff]  }
 0x3b4   :  { %3189 = vmatpush1.bf16.msra.mxu0 %v4773_v22  ;;  %3271 = vmatpush1.bf16.msra.mxu1 %v4776_v23  ;;  %v4855_v22 = vld [vmem:[#allocation11 + $0x10] sm:$0xff]  }
 0x3b5   :  { %3190 = vmatprep.subr.bf16.mxu0 %v4781_v24  ;;  %3272 = vmatprep.subr.bf16.mxu1 %v4784_v25  ;;  %v4856_v23 = vld [vmem:[#allocation11 + $0x90] sm:$0xff]   ;;  %v4857_v24 = vld [vmem:[#allocation11 + $0x58] sm:$0xff]  }
 0x3b6   :  { %v4858_v25 = vld [vmem:[#allocation11 + $0xd8] sm:$0xff]  }
 0x3b8   :  { %3191 = vmatpush1.bf16.msra.mxu0 %v4779_v26  ;;  %3273 = vmatpush1.bf16.msra.mxu1 %v4782_v27  ;;  %v4859_v26 = vld [vmem:[#allocation11 + $0x18] sm:$0xff]  }
 0x3b9   :  { %3192 = vmatprep.subr.bf16.mxu0 %v4787_v28  ;;  %3274 = vmatprep.subr.bf16.mxu1 %v4790_v29  ;;  %v4860_v27 = vld [vmem:[#allocation11 + $0x98] sm:$0xff]   ;;  %v4861_v28 = vld [vmem:[#allocation11 + $0x60] sm:$0xff]  }
 0x3ba   :  { %v4862_v29 = vld [vmem:[#allocation11 + $0xe0] sm:$0xff]  }
 0x3bc   :  { %3193 = vmatpush1.bf16.msra.mxu0 %v4785_v30  ;;  %3275 = vmatpush1.bf16.msra.mxu1 %v4788_v31  ;;  %v4863_v30 = vld [vmem:[#allocation11 + $0x20] sm:$0xff]  }
 0x3bd   :  { %3194 = vmatprep.subr.bf16.mxu0 %v4793_v32  ;;  %3276 = vmatprep.subr.bf16.mxu1 %v4796_v33  ;;  %v4864_v31 = vld [vmem:[#allocation11 + $0xa0] sm:$0xff]   ;;  %v4865_v32 = vld [vmem:[#allocation11 + $0x68] sm:$0xff]  }
 0x3be   :  { %v4866_v33 = vld [vmem:[#allocation11 + $0xe8] sm:$0xff]  }
 0x3c0   :  { %3195 = vmatpush1.bf16.msra.mxu0 %v4791_v34  ;;  %3277 = vmatpush1.bf16.msra.mxu1 %v4794_v35  ;;  %v4867_v34 = vld [vmem:[#allocation11 + $0x28] sm:$0xff]  }
 0x3c1   :  { %3196 = vmatprep.subr.bf16.mxu0 %v4799_v36  ;;  %3278 = vmatprep.subr.bf16.mxu1 %v4802_v41  ;;  %v4868_v35 = vld [vmem:[#allocation11 + $0xa8] sm:$0xff]   ;;  %v4869_v36 = vld [vmem:[#allocation11 + $0x70] sm:$0xff]  }
 0x3c2   :  { %v4870_v41 = vld [vmem:[#allocation11 + $0xf0] sm:$0xff]  }
 0x3c4   :  { %3197 = vmatpush1.bf16.msra.mxu0 %v4797_v10  ;;  %3279 = vmatpush1.bf16.msra.mxu1 %v4800_v42  ;;  %v4871_v10 = vld [vmem:[#allocation11 + $0x30] sm:$0xff]  }
 0x3c5   :  { %3198 = vmatprep.subr.bf16.mxu0 %v4805_v43  ;;  %3280 = vmatprep.subr.bf16.mxu1 %v4808_v44  ;;  %v4872_v42 = vld [vmem:[#allocation11 + $0xb0] sm:$0xff]   ;;  %v4873_v43 = vld [vmem:[#allocation11 + $0x78] sm:$0xff]  }
 0x3c6   :  { %v4874_v44 = vld [vmem:[#allocation11 + $0xf8] sm:$0xff]  }
 0x3c8   :  { %3199 = vmatpush1.bf16.msra.mxu0 %v4803_v45  ;;  %3281 = vmatpush1.bf16.msra.mxu1 %v4806_v15  ;;  %v4875_v45 = vld [vmem:[#allocation11 + $0x38] sm:$0xff]  }
 0x3c9   :  { %3200 = vmatprep.subr.bf16.mxu0 %v4811_v46  ;;  %3282 = vmatprep.subr.bf16.mxu1 %v4814_v48  ;;  %v4876_v15 = vld [vmem:[#allocation11 + $0xb8] sm:$0xff]  }
 0x3ca   :  { %v2477_v46 = vld [vmem:[%s5293_s8] sm:$0xf] }
 0x3cb   :  { %v2482_v48 = vrot.slane %v2477_v46, %v5204_v38 }
 0x3cc   :  { %3201 = vmatpush1.bf16.msra.mxu0 %v4809_v49  ;;  %3283 = vmatpush1.bf16.msra.mxu1 %v4812_v50  ;;  %v2490_v49 = vrot.slane %v2477_v46, %v5226_v53  ;;  %v2486_v50 = vrot.slane %v2477_v46, %v5212_v40 }
 0x3cd   :  { %3202 = vmatprep.subr.bf16.mxu0 %v4817_v52  ;;  %3284 = vmatprep.subr.bf16.mxu1 %v4820_v55  ;;  %v2494_v52 = vrot.slane %v2477_v46, %v5219_v51 }
 0x3d0   :  { %3203 = vmatpush1.bf16.msra.mxu0 %v4815_v56  ;;  %3285 = vmatpush1.bf16.msra.mxu1 %v4818_v57 }
 0x3d1   :  { %3204 = vmatprep.subr.bf16.mxu0 %v4823_v58  ;;  %3286 = vmatprep.subr.bf16.mxu1 %v4826_v59 }
 0x3d4   :  { %3205 = vmatpush1.bf16.msra.mxu0 %v4821_v60  ;;  %3287 = vmatpush1.bf16.msra.mxu1 %v4824_v61 }
 0x3d5   :  { %3206 = vmatprep.subr.bf16.mxu0 %v4829_v62  ;;  %3288 = vmatprep.subr.bf16.mxu1 %v4832_v37 }
 0x3d8   :  { %3207 = vmatpush1.bf16.msra.mxu0 %v4827_v0  ;;  %3289 = vmatpush1.bf16.msra.mxu1 %v4830_v1 }
 0x3d9   :  { %3208 = vmatprep.subr.bf16.mxu0 %v4835_v3  ;;  %3290 = vmatprep.subr.bf16.mxu1 %v4838_v4 }
 0x3dc   :  { %3209 = vmatpush1.bf16.msra.mxu0 %v4833_v39  ;;  %3291 = vmatpush1.bf16.msra.mxu1 %v4836_v5 }
 0x3dd   :  { %3210 = vmatprep.subr.bf16.mxu0 %v4841_v7  ;;  %3292 = vmatprep.subr.bf16.mxu1 %v4844_v8  ;;  %v4095_v8 = vld [vmem:[%s5295_s10] ss:$0 sm:$0xff]  ;;  %s5013_s10 = scalar_lea.vmem %s3668_s19, 128 }
 0x3de   :  { %p5014_p6 = scmp.ne.s32.totalorder %s3668_s19, %s5013_s10  ;;  %p5019_p8 = scmp.lt.s32.totalorder %s5013_s10, %s5013_s10 }
 0x3e0   :  { %3211 = vmatpush1.bf16.msra.mxu0 %v4839_v63  ;;  %3293 = vmatpush1.bf16.msra.mxu1 %v4842_v9  ;;  %p5020_p9 = por %p5019_p8, %p5018_p7 }
 0x3e1   :  { %4129 = vmatprep.subr.bf16.mxu0 %v4845_v47  ;;  %4151 = vmatprep.subr.bf16.mxu1 %v4846_v12 }
 0x3e2   :  { %p5021_p10 = pnand %p5020_p9, %p5014_p6 }
 0x3e3   :  { %3213 = vmatmul.mubr.bf16.vlgmr.msra.gmra.mrb[12].mxu0 %v2347_v16  ;;  %3295 = vmatmul.mubr.bf16.vlgmr.msra.gmra.mrb[12].mxu1 %v2347_v16 }
 0x3e4   :  { %4130 = vmatpush3.bf16.msra.mxu0 %v4847_v13  ;;  %4152 = vmatpush3.bf16.msra.mxu1 %v4848_v14 }
 0x3e5   :  { %4131 = vmatprep.subr.bf16.mxu0 %v4849_v54  ;;  %4153 = vmatprep.subr.bf16.mxu1 %v4850_v17 }
 0x3e8   :  { %4132 = vmatpush3.bf16.msra.mxu0 %v4851_v18  ;;  %4154 = vmatpush3.bf16.msra.mxu1 %v4852_v19 }
 0x3e9   :  { %4133 = vmatprep.subr.bf16.mxu0 %v4853_v20  ;;  %4155 = vmatprep.subr.bf16.mxu1 %v4854_v21 }
 0x3ec   :  { %4134 = vmatpush3.bf16.msra.mxu0 %v4855_v22  ;;  %4156 = vmatpush3.bf16.msra.mxu1 %v4856_v23 }
 0x3ed   :  { %4135 = vmatprep.subr.bf16.mxu0 %v4857_v24  ;;  %4157 = vmatprep.subr.bf16.mxu1 %v4858_v25 }
 0x3f0   :  { %4136 = vmatpush3.bf16.msra.mxu0 %v4859_v26  ;;  %4158 = vmatpush3.bf16.msra.mxu1 %v4860_v27 }
 0x3f1   :  { %4137 = vmatprep.subr.bf16.mxu0 %v4861_v28  ;;  %4159 = vmatprep.subr.bf16.mxu1 %v4862_v29 }
 0x3f4   :  { %4138 = vmatpush3.bf16.msra.mxu0 %v4863_v30  ;;  %4160 = vmatpush3.bf16.msra.mxu1 %v4864_v31 }
 0x3f5   :  { %4139 = vmatprep.subr.bf16.mxu0 %v4865_v32  ;;  %4161 = vmatprep.subr.bf16.mxu1 %v4866_v33 }
 0x3f8   :  { %4140 = vmatpush3.bf16.msra.mxu0 %v4867_v34  ;;  %4162 = vmatpush3.bf16.msra.mxu1 %v4868_v35 }
 0x3f9   :  { %4141 = vmatprep.subr.bf16.mxu0 %v4869_v36  ;;  %4163 = vmatprep.subr.bf16.mxu1 %v4870_v41 }
 0x3fc   :  { %4142 = vmatpush3.bf16.msra.mxu0 %v4871_v10  ;;  %4164 = vmatpush3.bf16.msra.mxu1 %v4872_v42 }
 0x3fd   :  { %4143 = vmatprep.subr.bf16.mxu0 %v4873_v43  ;;  %4165 = vmatprep.subr.bf16.mxu1 %v4874_v44 }
 0x400   :  { %4144 = vmatpush3.bf16.msra.mxu0 %v4875_v45  ;;  %4166 = vmatpush3.bf16.msra.mxu1 %v4876_v15 }
 0x4b6   :  { %v3214_v55 = vpop.f32.mrb[12].mxu0  ;;  %v3296_v56 = vpop.f32.mrb[12].mxu1 }
 0x4b7   :  { %v4181_v57 = vadd.f32 %v3214_v55, %v2482_v48  ;;  %v4183_v58 = vadd.f32 %v3296_v56, %v2490_v49  ;;  %v3216_v59 = vpop.f32.mrb[13].mxu0  ;;  %v3298_v60 = vpop.f32.mrb[13].mxu1 }
 0x4b8   :  { %v4182_v61 = vadd.f32 %v3216_v59, %v2486_v50  ;;  %v4184_v62 = vadd.f32 %v3298_v60, %v2494_v52  ;;  %v3218_v37 = vpop.f32.mrb[14].mxu0  ;;  %v3300_v0 = vpop.f32.mrb[14].mxu1 }
 0x4b9   :  { %v3303_v1 = vmax.f32 %v4181_v57, 0.0  ;;  %v3305_v2 = vmax.f32 %v4183_v58, 0.0  ;;  %v3219_v3 = vpop.f32.mrb[15].mxu0  ;;  %v3301_v38 = vpop.f32.mrb[15].mxu1 }
 0x4ba   :  { %v3304_v4 = vmax.f32 %v4182_v61, 0.0  ;;  %v3306_v53 = vmax.f32 %v4184_v62, 0.0 }
 0x4bb   :  { %v3307_v5 = vpack.c.bf16 %v3303_v1, %v3303_v1  ;;  %v3309_v51 = vpack.c.bf16 %v3305_v2, %v3305_v2 }
 0x4bc   :  { %v3308_v39 = vpack.c.bf16 %v3304_v4, %v3304_v4  ;;  %v3310_v40 = vpack.c.bf16 %v3306_v53, %v3306_v53 }
 0x4be   :  { %3606 = vmatprep.mubr.bf16.mxu0 %v3308_v39  ;;  %3646 = vmatprep.mubr.bf16.mxu1 %v3310_v40 }
 0x4bf   :  { %3607 = vmatmul.mubr.bf16.vlgmr.msra.gmra.mrb[16].mxu0 %v3307_v5  ;;  %3647 = vmatmul.mubr.bf16.vlgmr.msra.gmra.mrb[16].mxu1 %v3309_v51 }
 0x592   :  { %v4145_v6 = vpop.f32.mrb[16].mxu0  ;;  %v4167_v7 = vpop.f32.mrb[16].mxu1 }
 0x593   :  { %v4146_v63 = vpop.f32.mrb[17].mxu0  ;;  %v4168_v9 = vpop.f32.mrb[17].mxu1 }
 0x594   :  { %v4147_v11 = vadd.f32 %v4146_v63, %v4145_v6  ;;  %v4169_v47 = vadd.f32 %v4168_v9, %v4167_v7  ;;  %v4148_v12 = vpop.f32.mrb[18].mxu0  ;;  %v4170_v13 = vpop.f32.mrb[18].mxu1 }
 0x595   :  { %v4149_v14 = vpop.f32.mrb[19].mxu0  ;;  %v4171_v16 = vpop.f32.mrb[19].mxu1 }
 0x596   :  { %v3609_v54 = vadd.f32 %v4147_v11, %v4095_v8 }
 0x598   :  { %v3649_v17 = vadd.f32 %v4169_v47, %v3609_v54 }
 0x59a   :  { %v4128_v18 = vmul.f32 -1.442695, %v3649_v17 }
 0x59c   :  { %4877 = vpow2.f32 %v4128_v18 }
 0x5a6   :  { %v4878_v19 = vpop.eup %4877 }
 0x5a7   :  { %v3657_v20 = vadd.f32 1.0, %v4878_v19 }
 0x5a9   :  { %4879 = vrcp.f32 %v3657_v20 }
 0x5b3   :  { %v4880_v21 = vpop.eup %4879 }
 0x5b4   :  { %3660 = vst [vmem:[#allocation13] sm:$0xff] %v4880_v21 }
 0x5b5   :  { %5024 = shalt.err (!%p5021_p10)
}
 0x5b6   :  { %s5025_s20 = scalar_lea.hbm %s5296_s11, 128 }
 0x5b7   :  { %p5026_p11 = scmp.ne.s32.totalorder %s5296_s11, %s5025_s20  ;;  %p5029_p12 = scmp.lt.u32.totalorder %s5025_s20, %s5296_s11 }
 0x5b9   :  { %p5031_p13 = pnand %p5029_p12, %p5026_p11 }
 0x5bb   :  { %5034 = shalt.err (!%p5031_p13)
}
 0x5bc   :  { %3670 = dma.vmem_to_hbm [thread:$0]  %s3668_s19, 128, %s5296_s11, [#allocation4]  }
 0x5bd   :  { %5043 = dma.done.wait [#allocation4], 128  }
 0x5be   :  { %5044 = vsyncadd [#allocation4], 4294967168 }
 0x5bf   :  { %3674 = vsyncpa [#allocation3], 1 }
 0x5c0   :  { %3675 = vsyncpa [#allocation6], 1 }
 0x5c1   :  { %3676 = vsyncpa [#allocation9], 1 }
 0x5c2   :  { %3677 = vsyncpa [#allocation12], 1 }
 0x5c3   :  { %3678 = vsyncpa [#allocation4], 1 }

</bundles_post_ra>
